<compile_context>
chip_gen: v7x
topology: tpu7x:2x2x1
jax: 0.10.0
libtpu: 0.0.40
codegen_flags: <defaults>
</compile_context>

<pallas_src>
import math

import jax
import jax.numpy as jnp
from jax.experimental import pallas as pl
from jax.experimental.pallas import tpu as pltpu

_VMEM_LIMIT = 64 * 1024 * 1024  # explicit budget; safe on v5e/v6e/v7x


def _row_tile(m):
    """Largest row tile that divides M (multiple of 8), else the full extent."""
    for t in (512, 256, 128, 64, 32, 16, 8):
        if m % t == 0:
            return t
    return m


# ----------------------------- Pallas kernels -----------------------------


def _ln_matmul_kernel(x_ref, g_ref, w_ref, o_ref):
    # T5LayerNorm (RMSNorm, no mean/bias, fp32 stats) fused with x @ W.
    x = x_ref[...].astype(jnp.float32)
    var = jnp.mean(x * x, axis=-1, keepdims=True)
    normed = (x * jax.lax.rsqrt(var + 1e-6) * g_ref[...]).astype(jnp.bfloat16)
    o_ref[...] = jnp.dot(
        normed, w_ref[...], preferred_element_type=jnp.float32
    ).astype(o_ref.dtype)


def pallas_ln_matmul(x, gamma, w):
    # x: [M, D] bf16, gamma: [1, D] f32, w: [D, N] bf16 -> [M, N] bf16
    m, d = x.shape
    n = w.shape[1]
    tm = _row_tile(m)
    return pl.pallas_call(
        _ln_matmul_kernel,
        out_shape=jax.ShapeDtypeStruct((m, n), jnp.bfloat16),
        grid=(m // tm,),
        in_specs=[
            pl.BlockSpec((tm, d), lambda i: (i, 0)),
            pl.BlockSpec((1, d), lambda i: (0, 0)),
            pl.BlockSpec((d, n), lambda i: (0, 0)),
        ],
        out_specs=pl.BlockSpec((tm, n), lambda i: (i, 0)),
        compiler_params=pltpu.CompilerParams(
            dimension_semantics=("parallel",),
            vmem_limit_bytes=_VMEM_LIMIT,
        ),
    )(x, gamma, w)


def _ln_ff_kernel(x_ref, g_ref, wi0_ref, wi1_ref, wo_ref, o_ref):
    # RMSNorm + gated-GELU FF (T5 v1.1 / mT5) + residual, all in one VMEM pass.
    x = x_ref[...].astype(jnp.float32)
    var = jnp.mean(x * x, axis=-1, keepdims=True)
    normed = (x * jax.lax.rsqrt(var + 1e-6) * g_ref[...]).astype(jnp.bfloat16)
    h0 = jnp.dot(normed, wi0_ref[...], preferred_element_type=jnp.float32)
    h1 = jnp.dot(normed, wi1_ref[...], preferred_element_type=jnp.float32)
    c = math.sqrt(2.0 / math.pi)
    gelu = 0.5 * h0 * (1.0 + jnp.tanh(c * (h0 + 0.044715 * h0 * h0 * h0)))
    inter = (gelu * h1).astype(jnp.bfloat16)
    y = jnp.dot(inter, wo_ref[...], preferred_element_type=jnp.float32)
    o_ref[...] = (x + y).astype(o_ref.dtype)


def pallas_ln_ff(x, gamma, wi0, wi1, wo):
    # x: [M, D] bf16 -> [M, D] bf16 (residual already added)
    m, d = x.shape
    dff = wi0.shape[1]
    tm = _row_tile(m)
    return pl.pallas_call(
        _ln_ff_kernel,
        out_shape=jax.ShapeDtypeStruct((m, d), jnp.bfloat16),
        grid=(m // tm,),
        in_specs=[
            pl.BlockSpec((tm, d), lambda i: (i, 0)),
            pl.BlockSpec((1, d), lambda i: (0, 0)),
            pl.BlockSpec((d, dff), lambda i: (0, 0)),
            pl.BlockSpec((d, dff), lambda i: (0, 0)),
            pl.BlockSpec((dff, d), lambda i: (0, 0)),
        ],
        out_specs=pl.BlockSpec((tm, d), lambda i: (i, 0)),
        compiler_params=pltpu.CompilerParams(
            dimension_semantics=("parallel",),
            vmem_limit_bytes=_VMEM_LIMIT,
        ),
    )(x, gamma, wi0, wi1, wo)


def _rmsnorm_kernel(x_ref, g_ref, o_ref):
    x = x_ref[...].astype(jnp.float32)
    var = jnp.mean(x * x, axis=-1, keepdims=True)
    o_ref[...] = (x * jax.lax.rsqrt(var + 1e-6) * g_ref[...]).astype(o_ref.dtype)


def pallas_rmsnorm(x, gamma, out_dtype=jnp.float32):
    m, d = x.shape
    tm = _row_tile(m)
    return pl.pallas_call(
        _rmsnorm_kernel,
        out_shape=jax.ShapeDtypeStruct((m, d), out_dtype),
        grid=(m // tm,),
        in_specs=[
            pl.BlockSpec((tm, d), lambda i: (i, 0)),
            pl.BlockSpec((1, d), lambda i: (0, 0)),
        ],
        out_specs=pl.BlockSpec((tm, d), lambda i: (i, 0)),
        compiler_params=pltpu.CompilerParams(
            dimension_semantics=("parallel",),
            vmem_limit_bytes=_VMEM_LIMIT,
        ),
    )(x, gamma)


def _make_attn_kernel(H, Dk):
    HDk = H * Dk

    def kernel(qkv_ref, bias_ref, mask_ref, res_ref, wo_ref, o_ref, attn_ref):
        # qkv_ref: (1, S, 3*H*Dk) bf16   bias_ref: (H, S, S) f32
        # mask_ref: (1, 1, S) f32        res_ref/o_ref: (1, S, D) bf16
        # wo_ref: (H*Dk, D) bf16         attn_ref: VMEM scratch (S, H*Dk) bf16
        qkv = qkv_ref[0]                  # [S, 3*H*Dk]
        mask = mask_ref[0]                # [1, S], broadcast over query rows
        for h in range(H):
            q = qkv[:, h * Dk:(h + 1) * Dk]
            k = qkv[:, HDk + h * Dk:HDk + (h + 1) * Dk]
            v = qkv[:, 2 * HDk + h * Dk:2 * HDk + (h + 1) * Dk]
            # T5: no 1/sqrt(d) scaling.  Contract over Dk (no explicit k.T).
            scores = jax.lax.dot_general(
                q, k, (((1,), (1,)), ((), ())),
                preferred_element_type=jnp.float32,
            )                             # [S, S] f32
            scores = scores + bias_ref[h] + mask
            m = jnp.max(scores, axis=-1, keepdims=True)
            p = jnp.exp(scores - m)
            denom = jnp.sum(p, axis=-1, keepdims=True)
            p = (p * pl.reciprocal(denom, approx=True)).astype(jnp.bfloat16)
            attn_ref[:, h * Dk:(h + 1) * Dk] = jnp.dot(
                p, v, preferred_element_type=jnp.float32
            ).astype(jnp.bfloat16)
        # Single lane-dense output projection over all heads + residual add.
        proj = jnp.dot(attn_ref[...], wo_ref[...],
                       preferred_element_type=jnp.float32)   # [S, D] f32
        o_ref[0] = (res_ref[0].astype(jnp.float32) + proj).astype(o_ref.dtype)

    return kernel


def pallas_attention_block(qkv, pos_bias, mask_bias, residual, wo, H, Dk):
    # qkv: [B, S, 3*H*Dk] bf16, pos_bias: [H, S, S] f32, mask_bias: [B, 1, S] f32
    # residual: [B, S, D] bf16, wo: [H*Dk, D] bf16  ->  [B, S, D] bf16
    B, S, three_hdk = qkv.shape
    D = residual.shape[-1]
    return pl.pallas_call(
        _make_attn_kernel(H, Dk),
        out_shape=jax.ShapeDtypeStruct((B, S, D), jnp.bfloat16),
        grid=(B,),
        in_specs=[
            pl.BlockSpec((1, S, three_hdk), lambda b: (b, 0, 0)),
            pl.BlockSpec((H, S, S), lambda b: (0, 0, 0)),
            pl.BlockSpec((1, 1, S), lambda b: (b, 0, 0)),
            pl.BlockSpec((1, S, D), lambda b: (b, 0, 0)),
            pl.BlockSpec((H * Dk, D), lambda b: (0, 0)),
        ],
        out_specs=pl.BlockSpec((1, S, D), lambda b: (b, 0, 0)),
        scratch_shapes=[pltpu.VMEM((S, H * Dk), jnp.bfloat16)],
        compiler_params=pltpu.CompilerParams(
            dimension_semantics=("parallel",),
            vmem_limit_bytes=_VMEM_LIMIT,
        ),
    )(qkv, pos_bias, mask_bias, residual, wo)


# ------------------------- T5 encoder glue (JAX) --------------------------


def _relative_position_bucket(relative_position, num_buckets=32, max_distance=128):
    # Bidirectional bucketing (encoder); matches HF T5Attention._relative_position_bucket.
    relative_buckets = 0
    num_buckets //= 2
    relative_buckets += (relative_position > 0).astype(jnp.int32) * num_buckets
    relative_position = jnp.abs(relative_position)
    max_exact = num_buckets // 2
    is_small = relative_position < max_exact
    rp_large = max_exact + (
        jnp.log(jnp.maximum(relative_position, 1).astype(jnp.float32) / max_exact)
        / math.log(max_distance / max_exact)
        * (num_buckets - max_exact)
    ).astype(jnp.int32)
    rp_large = jnp.minimum(rp_large, num_buckets - 1)
    relative_buckets += jnp.where(is_small, relative_position, rp_large)
    return relative_buckets


def compute_position_bias(rel_bias_table, seq_len, num_buckets, max_distance):
    # rel_bias_table: [num_buckets, H] -> [H, S, S] (shared across batch; not broadcast).
    ctx = jnp.arange(seq_len)[:, None]
    mem = jnp.arange(seq_len)[None, :]
    buckets = _relative_position_bucket(mem - ctx, num_buckets, max_distance)
    values = jnp.take(rel_bias_table, buckets, axis=0)     # [S, S, H]
    return jnp.transpose(values, (2, 0, 1)).astype(jnp.float32)


def init_params(key, cfg):
    D, H, Dk, Dff = cfg["d_model"], cfg["num_heads"], cfg["d_kv"], cfg["d_ff"]
    ks = jax.random.split(key, 3 + 5 * cfg["num_layers"])

    def w(k, shape):
        return (jax.random.normal(k, shape, jnp.float32) * 0.02).astype(jnp.bfloat16)

    params = {
        "embed": w(ks[0], (cfg["vocab"], D)),
        "rel_bias": jax.random.normal(ks[1], (cfg["rel_buckets"], H), jnp.float32) * 0.02,
        "final_ln": jnp.ones((1, D), jnp.float32),
        "layers": [],
    }
    i = 3
    for _ in range(cfg["num_layers"]):
        params["layers"].append({
            "ln1": jnp.ones((1, D), jnp.float32),
            "wqkv": w(ks[i + 0], (D, 3 * H * Dk)),   # fused Q|K|V projection
            "wo": w(ks[i + 1], (H * Dk, D)),
            "ln2": jnp.ones((1, D), jnp.float32),
            "wi0": w(ks[i + 2], (D, Dff)),
            "wi1": w(ks[i + 3], (D, Dff)),
            "wo_ff": w(ks[i + 4], (Dff, D)),
        })
        i += 5
    return params


def t5_encoder_forward(params, input_ids, attention_mask, cfg):
    B, S = input_ids.shape
    D, H, Dk = cfg["d_model"], cfg["num_heads"], cfg["d_kv"]

    # Token embedding lookup (data-dependent gather) — plain JAX glue.
    # TODO(synk): embedding gather kept as jnp.take; no clean blocked BlockSpec form.
    hidden = jnp.take(params["embed"], input_ids, axis=0)            # [B,S,D] bf16

    # Additive mask [B,1,S] (HF: (1 - mask) * finfo.min) and shared position bias [H,S,S].
    mask_bias = ((1.0 - attention_mask.astype(jnp.float32))
                 * jnp.finfo(jnp.float32).min)[:, None, :]
    pos_bias = compute_position_bias(params["rel_bias"], S,
                                     cfg["rel_buckets"], cfg["rel_max_distance"])

    for layer in params["layers"]:
        # --- self-attention block: LN + fused QKV, then attn + wo + residual ---
        flat = hidden.reshape(B * S, D)
        qkv = pallas_ln_matmul(flat, layer["ln1"], layer["wqkv"])     # [B*S, 3*H*Dk]
        hidden = pallas_attention_block(
            qkv.reshape(B, S, 3 * H * Dk), pos_bias, mask_bias,
            hidden, layer["wo"], H, Dk)                               # [B,S,D] bf16

        # --- gated-GELU feed-forward block: LN + FF + residual in one kernel ---
        flat = hidden.reshape(B * S, D)
        hidden = pallas_ln_ff(flat, layer["ln2"], layer["wi0"],
                              layer["wi1"], layer["wo_ff"]).reshape(B, S, D)

    out = pallas_rmsnorm(hidden.reshape(B * S, D), params["final_ln"],
                         out_dtype=jnp.float32)
    return out.reshape(B, S, D)  # last_hidden_state, [B, S, D] f32


# ---------------------------------- main -----------------------------------

if __name__ == "__main__":
    cfg = dict(
        vocab=64, d_model=32, num_heads=4, d_kv=8, d_ff=64,
        num_layers=2, rel_buckets=32, rel_max_distance=128, max_length=8,
    )
    B, S = 2, cfg["max_length"]

    key = jax.random.PRNGKey(0)
    k_tok, k_param = jax.random.split(key)

    # Deterministic stand-in for the tokenizer output (padding='max_length').
    input_ids = jax.random.randint(k_tok, (B, S), 0, cfg["vocab"], dtype=jnp.int32)
    lengths = jnp.array([S, 5], dtype=jnp.int32)
    attention_mask = (jnp.arange(S)[None, :] < lengths[:, None]).astype(jnp.int32)

    params = init_params(k_param, cfg)

    fwd = jax.jit(lambda p, ids, m: t5_encoder_forward(p, ids, m, cfg))
    text_embeddings = jax.block_until_ready(fwd(params, input_ids, attention_mask))

    assert text_embeddings.shape == (B, S, cfg["d_model"])
    assert bool(jnp.all(jnp.isfinite(text_embeddings)))
    print("KERNEL_OK")
</pallas_src>

<mosaic_0001>
module attributes {stable_mosaic.version = 11 : i64} {
  func.func @_ln_matmul_kernel(%arg0: i32, %arg1: memref<16x32xbf16, #tpu.memory_space<vmem>>, %arg2: memref<1x32xf32, #tpu.memory_space<vmem>>, %arg3: memref<32x96xbf16, #tpu.memory_space<vmem>>, %arg4: memref<16x96xbf16, #tpu.memory_space<vmem>>) attributes {dimension_semantics = [#tpu.dimension_semantics<parallel>], iteration_bounds = array<i64: 1>, scalar_prefetch = 0 : i64, scratch_operands = 0 : i64, tpu.core_type = #tpu.core_type<tc>, window_params = [{transform_indices = @transform_0, window_bounds = array<i64: 16, 32>}, {pipeline_mode = #tpu.pipeline_mode<synchronous>, transform_indices = @transform_1, window_bounds = array<i64: 1, 32>}, {pipeline_mode = #tpu.pipeline_mode<synchronous>, transform_indices = @transform_2, window_bounds = array<i64: 32, 96>}, {transform_indices = @transform_3, window_bounds = array<i64: 16, 96>}]} {
    %c0 = arith.constant 0 : index
    %c0_0 = arith.constant 0 : index
    %0 = vector.load %arg1[%c0, %c0_0] : memref<16x32xbf16, #tpu.memory_space<vmem>>, vector<16x32xbf16>
    %1 = arith.extf %0 : vector<16x32xbf16> to vector<16x32xf32>
    %2 = arith.mulf %1, %1 : vector<16x32xf32>
    %cst = arith.constant dense<0.000000e+00> : vector<16xf32>
    %3 = vector.multi_reduction <add>, %2, %cst [1] : vector<16x32xf32> to vector<16xf32>
    %4 = vector.shape_cast %3 : vector<16xf32> to vector<16x1xf32>
    %cst_1 = arith.constant 3.200000e+01 : f32
    %5 = vector.broadcast %cst_1 : f32 to vector<16x1xf32>
    %6 = arith.divf %4, %5 : vector<16x1xf32>
    %cst_2 = arith.constant 9.99999997E-7 : f32
    %7 = vector.broadcast %cst_2 : f32 to vector<16x1xf32>
    %8 = arith.addf %6, %7 : vector<16x1xf32>
    %9 = math.rsqrt %8 : vector<16x1xf32>
    %10 = vector.broadcast %9 : vector<16x1xf32> to vector<16x32xf32>
    %11 = arith.mulf %1, %10 : vector<16x32xf32>
    %c0_3 = arith.constant 0 : index
    %c0_4 = arith.constant 0 : index
    %12 = vector.load %arg2[%c0_3, %c0_4] : memref<1x32xf32, #tpu.memory_space<vmem>>, vector<1x32xf32>
    %13 = vector.broadcast %12 : vector<1x32xf32> to vector<16x32xf32>
    %14 = arith.mulf %11, %13 : vector<16x32xf32>
    %15 = arith.truncf %14 : vector<16x32xf32> to vector<16x32xbf16>
    %c0_5 = arith.constant 0 : index
    %c0_6 = arith.constant 0 : index
    %16 = vector.load %arg3[%c0_5, %c0_6] : memref<32x96xbf16, #tpu.memory_space<vmem>>, vector<32x96xbf16>
    %cst_7 = arith.constant dense<0.000000e+00> : vector<16x96xf32>
    %17 = tpu.matmul %15, %16, %cst_7 {dimension_numbers = #tpu.dot_dimension_numbers<[1], [0], [0], [1], [0, 0, 1, 1], [], []>} : vector<16x32xbf16>, vector<32x96xbf16>, vector<16x96xf32> -> vector<16x96xf32>
    %18 = arith.truncf %17 : vector<16x96xf32> to vector<16x96xbf16>
    %c0_8 = arith.constant 0 : index
    %c0_9 = arith.constant 0 : index
    %19 = vector.load %arg4[%c0_8, %c0_9] : memref<16x96xbf16, #tpu.memory_space<vmem>>, vector<16x96xbf16>
    tpu.vector_store %arg4[%c0_8, %c0_9], %18 {strides = array<i32>} : memref<16x96xbf16, #tpu.memory_space<vmem>>, vector<16x96xbf16>,
    return
  }
  func.func @transform_0(%arg0: i32) -> (i32, i32) {
    %c0_i32 = arith.constant 0 : i32
    %c0_i32_0 = arith.constant 0 : i32
    return %arg0, %c0_i32 : i32, i32
  }
  func.func @transform_1(%arg0: i32) -> (i32, i32) {
    %c0_i32 = arith.constant 0 : i32
    %c0_i32_0 = arith.constant 0 : i32
    %c0_i32_1 = arith.constant 0 : i32
    return %c0_i32, %c0_i32_0 : i32, i32
  }
  func.func @transform_2(%arg0: i32) -> (i32, i32) {
    %c0_i32 = arith.constant 0 : i32
    %c0_i32_0 = arith.constant 0 : i32
    %c0_i32_1 = arith.constant 0 : i32
    return %c0_i32, %c0_i32_0 : i32, i32
  }
  func.func @transform_3(%arg0: i32) -> (i32, i32) {
    %c0_i32 = arith.constant 0 : i32
    %c0_i32_0 = arith.constant 0 : i32
    return %arg0, %c0_i32 : i32, i32
  }
}

module attributes {stable_mosaic.version = 11 : i64} {
  func.func @kernel(%arg0: i32, %arg1: memref<1x8x96xbf16, #tpu.memory_space<vmem>>, %arg2: memref<4x8x8xf32, #tpu.memory_space<vmem>>, %arg3: memref<1x1x8xf32, #tpu.memory_space<vmem>>, %arg4: memref<1x8x32xbf16, #tpu.memory_space<vmem>>, %arg5: memref<32x32xbf16, #tpu.memory_space<vmem>>, %arg6: memref<1x8x32xbf16, #tpu.memory_space<vmem>>, %arg7: memref<8x32xbf16, #tpu.memory_space<vmem>>) attributes {dimension_semantics = [#tpu.dimension_semantics<parallel>], iteration_bounds = array<i64: 2>, scalar_prefetch = 0 : i64, scratch_operands = 1 : i64, tpu.core_type = #tpu.core_type<tc>, window_params = [{transform_indices = @transform_0, window_bounds = array<i64: 1, 8, 96>}, {pipeline_mode = #tpu.pipeline_mode<synchronous>, transform_indices = @transform_1, window_bounds = array<i64: 4, 8, 8>}, {transform_indices = @transform_2, window_bounds = array<i64: 1, 1, 8>}, {transform_indices = @transform_3, window_bounds = array<i64: 1, 8, 32>}, {pipeline_mode = #tpu.pipeline_mode<synchronous>, transform_indices = @transform_4, window_bounds = array<i64: 32, 32>}, {transform_indices = @transform_5, window_bounds = array<i64: 1, 8, 32>}]} {
    %c0 = arith.constant 0 : index
    %c0_0 = arith.constant 0 : index
    %c0_1 = arith.constant 0 : index
    %0 = vector.load %arg1[%c0, %c0_0, %c0_1] : memref<1x8x96xbf16, #tpu.memory_space<vmem>>, vector<1x8x96xbf16>
    %1 = vector.shape_cast %0 : vector<1x8x96xbf16> to vector<8x96xbf16>
    %c0_2 = arith.constant 0 : index
    %c0_3 = arith.constant 0 : index
    %c0_4 = arith.constant 0 : index
    %2 = vector.load %arg3[%c0_2, %c0_3, %c0_4] : memref<1x1x8xf32, #tpu.memory_space<vmem>>, vector<1x1x8xf32>
    %3 = vector.shape_cast %2 : vector<1x1x8xf32> to vector<1x8xf32>
    %4 = vector.extract_strided_slice %1 {offsets = [0, 0], sizes = [8, 8], strides = [1, 1]} : vector<8x96xbf16> to vector<8x8xbf16>
    %5 = vector.extract_strided_slice %1 {offsets = [0, 32], sizes = [8, 8], strides = [1, 1]} : vector<8x96xbf16> to vector<8x8xbf16>
    %6 = vector.extract_strided_slice %1 {offsets = [0, 64], sizes = [8, 8], strides = [1, 1]} : vector<8x96xbf16> to vector<8x8xbf16>
    %cst = arith.constant dense<0.000000e+00> : vector<8x8xf32>
    %7 = tpu.matmul %4, %5, %cst {dimension_numbers = #tpu.dot_dimension_numbers<[1], [1], [0], [0], [0, 0, 1, 0], [], []>} : vector<8x8xbf16>, vector<8x8xbf16>, vector<8x8xf32> -> vector<8x8xf32>
    %c0_5 = arith.constant 0 : index
    %c0_6 = arith.constant 0 : index
    %c0_7 = arith.constant 0 : index
    %8 = vector.load %arg2[%c0_5, %c0_6, %c0_7] : memref<4x8x8xf32, #tpu.memory_space<vmem>>, vector<1x8x8xf32>
    %9 = vector.shape_cast %8 : vector<1x8x8xf32> to vector<8x8xf32>
    %10 = arith.addf %7, %9 : vector<8x8xf32>
    %11 = vector.broadcast %3 : vector<1x8xf32> to vector<8x8xf32>
    %12 = arith.addf %10, %11 : vector<8x8xf32>
    %cst_8 = arith.constant dense<0xFF800000> : vector<8xf32>
    %13 = vector.multi_reduction <maximumf>, %12, %cst_8 [1] : vector<8x8xf32> to vector<8xf32>
    %14 = vector.shape_cast %13 : vector<8xf32> to vector<8x1xf32>
    %15 = vector.broadcast %14 : vector<8x1xf32> to vector<8x8xf32>
    %16 = arith.subf %12, %15 : vector<8x8xf32>
    %17 = math.exp %16 : vector<8x8xf32>
    %cst_9 = arith.constant dense<0.000000e+00> : vector<8xf32>
    %18 = vector.multi_reduction <add>, %17, %cst_9 [1] : vector<8x8xf32> to vector<8xf32>
    %19 = vector.shape_cast %18 : vector<8xf32> to vector<8x1xf32>
    %20 = tpu.reciprocal %19 {approx = true} : vector<8x1xf32> -> vector<8x1xf32>
    %21 = vector.broadcast %20 : vector<8x1xf32> to vector<8x8xf32>
    %22 = arith.mulf %17, %21 : vector<8x8xf32>
    %23 = arith.truncf %22 : vector<8x8xf32> to vector<8x8xbf16>
    %cst_10 = arith.constant dense<0.000000e+00> : vector<8x8xf32>
    %24 = tpu.matmul %23, %6, %cst_10 {dimension_numbers = #tpu.dot_dimension_numbers<[1], [0], [0], [1], [0, 0, 1, 1], [], []>} : vector<8x8xbf16>, vector<8x8xbf16>, vector<8x8xf32> -> vector<8x8xf32>
    %25 = arith.truncf %24 : vector<8x8xf32> to vector<8x8xbf16>
    %c0_11 = arith.constant 0 : index
    %c0_12 = arith.constant 0 : index
    %26 = vector.load %arg7[%c0_11, %c0_12] : memref<8x32xbf16, #tpu.memory_space<vmem>>, vector<8x8xbf16>
    tpu.vector_store %arg7[%c0_11, %c0_12], %25 {strides = array<i32>} : memref<8x32xbf16, #tpu.memory_space<vmem>>, vector<8x8xbf16>,
    %27 = vector.extract_strided_slice %1 {offsets = [0, 8], sizes = [8, 8], strides = [1, 1]} : vector<8x96xbf16> to vector<8x8xbf16>
    %28 = vector.extract_strided_slice %1 {offsets = [0, 40], sizes = [8, 8], strides = [1, 1]} : vector<8x96xbf16> to vector<8x8xbf16>
    %29 = vector.extract_strided_slice %1 {offsets = [0, 72], sizes = [8, 8], strides = [1, 1]} : vector<8x96xbf16> to vector<8x8xbf16>
    %cst_13 = arith.constant dense<0.000000e+00> : vector<8x8xf32>
    %30 = tpu.matmul %27, %28, %cst_13 {dimension_numbers = #tpu.dot_dimension_numbers<[1], [1], [0], [0], [0, 0, 1, 0], [], []>} : vector<8x8xbf16>, vector<8x8xbf16>, vector<8x8xf32> -> vector<8x8xf32>
    %c1 = arith.constant 1 : index
    %c0_14 = arith.constant 0 : index
    %c0_15 = arith.constant 0 : index
    %31 = vector.load %arg2[%c1, %c0_14, %c0_15] : memref<4x8x8xf32, #tpu.memory_space<vmem>>, vector<1x8x8xf32>
    %32 = vector.shape_cast %31 : vector<1x8x8xf32> to vector<8x8xf32>
    %33 = arith.addf %30, %32 : vector<8x8xf32>
    %34 = vector.broadcast %3 : vector<1x8xf32> to vector<8x8xf32>
    %35 = arith.addf %33, %34 : vector<8x8xf32>
    %cst_16 = arith.constant dense<0xFF800000> : vector<8xf32>
    %36 = vector.multi_reduction <maximumf>, %35, %cst_16 [1] : vector<8x8xf32> to vector<8xf32>
    %37 = vector.shape_cast %36 : vector<8xf32> to vector<8x1xf32>
    %38 = vector.broadcast %37 : vector<8x1xf32> to vector<8x8xf32>
    %39 = arith.subf %35, %38 : vector<8x8xf32>
    %40 = math.exp %39 : vector<8x8xf32>
    %cst_17 = arith.constant dense<0.000000e+00> : vector<8xf32>
    %41 = vector.multi_reduction <add>, %40, %cst_17 [1] : vector<8x8xf32> to vector<8xf32>
    %42 = vector.shape_cast %41 : vector<8xf32> to vector<8x1xf32>
    %43 = tpu.reciprocal %42 {approx = true} : vector<8x1xf32> -> vector<8x1xf32>
    %44 = vector.broadcast %43 : vector<8x1xf32> to vector<8x8xf32>
    %45 = arith.mulf %40, %44 : vector<8x8xf32>
    %46 = arith.truncf %45 : vector<8x8xf32> to vector<8x8xbf16>
    %cst_18 = arith.constant dense<0.000000e+00> : vector<8x8xf32>
    %47 = tpu.matmul %46, %29, %cst_18 {dimension_numbers = #tpu.dot_dimension_numbers<[1], [0], [0], [1], [0, 0, 1, 1], [], []>} : vector<8x8xbf16>, vector<8x8xbf16>, vector<8x8xf32> -> vector<8x8xf32>
    %48 = arith.truncf %47 : vector<8x8xf32> to vector<8x8xbf16>
    %c0_19 = arith.constant 0 : index
    %c8 = arith.constant 8 : index
    %49 = vector.load %arg7[%c0_19, %c8] : memref<8x32xbf16, #tpu.memory_space<vmem>>, vector<8x8xbf16>
    tpu.vector_store %arg7[%c0_19, %c8], %48 {strides = array<i32>} : memref<8x32xbf16, #tpu.memory_space<vmem>>, vector<8x8xbf16>,
    %50 = vector.extract_strided_slice %1 {offsets = [0, 16], sizes = [8, 8], strides = [1, 1]} : vector<8x96xbf16> to vector<8x8xbf16>
    %51 = vector.extract_strided_slice %1 {offsets = [0, 48], sizes = [8, 8], strides = [1, 1]} : vector<8x96xbf16> to vector<8x8xbf16>
    %52 = vector.extract_strided_slice %1 {offsets = [0, 80], sizes = [8, 8], strides = [1, 1]} : vector<8x96xbf16> to vector<8x8xbf16>
    %cst_20 = arith.constant dense<0.000000e+00> : vector<8x8xf32>
    %53 = tpu.matmul %50, %51, %cst_20 {dimension_numbers = #tpu.dot_dimension_numbers<[1], [1], [0], [0], [0, 0, 1, 0], [], []>} : vector<8x8xbf16>, vector<8x8xbf16>, vector<8x8xf32> -> vector<8x8xf32>
    %c2 = arith.constant 2 : index
    %c0_21 = arith.constant 0 : index
    %c0_22 = arith.constant 0 : index
    %54 = vector.load %arg2[%c2, %c0_21, %c0_22] : memref<4x8x8xf32, #tpu.memory_space<vmem>>, vector<1x8x8xf32>
    %55 = vector.shape_cast %54 : vector<1x8x8xf32> to vector<8x8xf32>
    %56 = arith.addf %53, %55 : vector<8x8xf32>
    %57 = vector.broadcast %3 : vector<1x8xf32> to vector<8x8xf32>
    %58 = arith.addf %56, %57 : vector<8x8xf32>
    %cst_23 = arith.constant dense<0xFF800000> : vector<8xf32>
    %59 = vector.multi_reduction <maximumf>, %58, %cst_23 [1] : vector<8x8xf32> to vector<8xf32>
    %60 = vector.shape_cast %59 : vector<8xf32> to vector<8x1xf32>
    %61 = vector.broadcast %60 : vector<8x1xf32> to vector<8x8xf32>
    %62 = arith.subf %58, %61 : vector<8x8xf32>
    %63 = math.exp %62 : vector<8x8xf32>
    %cst_24 = arith.constant dense<0.000000e+00> : vector<8xf32>
    %64 = vector.multi_reduction <add>, %63, %cst_24 [1] : vector<8x8xf32> to vector<8xf32>
    %65 = vector.shape_cast %64 : vector<8xf32> to vector<8x1xf32>
    %66 = tpu.reciprocal %65 {approx = true} : vector<8x1xf32> -> vector<8x1xf32>
    %67 = vector.broadcast %66 : vector<8x1xf32> to vector<8x8xf32>
    %68 = arith.mulf %63, %67 : vector<8x8xf32>
    %69 = arith.truncf %68 : vector<8x8xf32> to vector<8x8xbf16>
    %cst_25 = arith.constant dense<0.000000e+00> : vector<8x8xf32>
    %70 = tpu.matmul %69, %52, %cst_25 {dimension_numbers = #tpu.dot_dimension_numbers<[1], [0], [0], [1], [0, 0, 1, 1], [], []>} : vector<8x8xbf16>, vector<8x8xbf16>, vector<8x8xf32> -> vector<8x8xf32>
    %71 = arith.truncf %70 : vector<8x8xf32> to vector<8x8xbf16>
    %c0_26 = arith.constant 0 : index
    %c16 = arith.constant 16 : index
    %72 = vector.load %arg7[%c0_26, %c16] : memref<8x32xbf16, #tpu.memory_space<vmem>>, vector<8x8xbf16>
    tpu.vector_store %arg7[%c0_26, %c16], %71 {strides = array<i32>} : memref<8x32xbf16, #tpu.memory_space<vmem>>, vector<8x8xbf16>,
    %73 = vector.extract_strided_slice %1 {offsets = [0, 24], sizes = [8, 8], strides = [1, 1]} : vector<8x96xbf16> to vector<8x8xbf16>
    %74 = vector.extract_strided_slice %1 {offsets = [0, 56], sizes = [8, 8], strides = [1, 1]} : vector<8x96xbf16> to vector<8x8xbf16>
    %75 = vector.extract_strided_slice %1 {offsets = [0, 88], sizes = [8, 8], strides = [1, 1]} : vector<8x96xbf16> to vector<8x8xbf16>
    %cst_27 = arith.constant dense<0.000000e+00> : vector<8x8xf32>
    %76 = tpu.matmul %73, %74, %cst_27 {dimension_numbers = #tpu.dot_dimension_numbers<[1], [1], [0], [0], [0, 0, 1, 0], [], []>} : vector<8x8xbf16>, vector<8x8xbf16>, vector<8x8xf32> -> vector<8x8xf32>
    %c3 = arith.constant 3 : index
    %c0_28 = arith.constant 0 : index
    %c0_29 = arith.constant 0 : index
    %77 = vector.load %arg2[%c3, %c0_28, %c0_29] : memref<4x8x8xf32, #tpu.memory_space<vmem>>, vector<1x8x8xf32>
    %78 = vector.shape_cast %77 : vector<1x8x8xf32> to vector<8x8xf32>
    %79 = arith.addf %76, %78 : vector<8x8xf32>
    %80 = vector.broadcast %3 : vector<1x8xf32> to vector<8x8xf32>
    %81 = arith.addf %79, %80 : vector<8x8xf32>
    %cst_30 = arith.constant dense<0xFF800000> : vector<8xf32>
    %82 = vector.multi_reduction <maximumf>, %81, %cst_30 [1] : vector<8x8xf32> to vector<8xf32>
    %83 = vector.shape_cast %82 : vector<8xf32> to vector<8x1xf32>
    %84 = vector.broadcast %83 : vector<8x1xf32> to vector<8x8xf32>
    %85 = arith.subf %81, %84 : vector<8x8xf32>
    %86 = math.exp %85 : vector<8x8xf32>
    %cst_31 = arith.constant dense<0.000000e+00> : vector<8xf32>
    %87 = vector.multi_reduction <add>, %86, %cst_31 [1] : vector<8x8xf32> to vector<8xf32>
    %88 = vector.shape_cast %87 : vector<8xf32> to vector<8x1xf32>
    %89 = tpu.reciprocal %88 {approx = true} : vector<8x1xf32> -> vector<8x1xf32>
    %90 = vector.broadcast %89 : vector<8x1xf32> to vector<8x8xf32>
    %91 = arith.mulf %86, %90 : vector<8x8xf32>
    %92 = arith.truncf %91 : vector<8x8xf32> to vector<8x8xbf16>
    %cst_32 = arith.constant dense<0.000000e+00> : vector<8x8xf32>
    %93 = tpu.matmul %92, %75, %cst_32 {dimension_numbers = #tpu.dot_dimension_numbers<[1], [0], [0], [1], [0, 0, 1, 1], [], []>} : vector<8x8xbf16>, vector<8x8xbf16>, vector<8x8xf32> -> vector<8x8xf32>
    %94 = arith.truncf %93 : vector<8x8xf32> to vector<8x8xbf16>
    %c0_33 = arith.constant 0 : index
    %c24 = arith.constant 24 : index
    %95 = vector.load %arg7[%c0_33, %c24] : memref<8x32xbf16, #tpu.memory_space<vmem>>, vector<8x8xbf16>
    tpu.vector_store %arg7[%c0_33, %c24], %94 {strides = array<i32>} : memref<8x32xbf16, #tpu.memory_space<vmem>>, vector<8x8xbf16>,
    %c0_34 = arith.constant 0 : index
    %c0_35 = arith.constant 0 : index
    %96 = vector.load %arg7[%c0_34, %c0_35] : memref<8x32xbf16, #tpu.memory_space<vmem>>, vector<8x32xbf16>
    %c0_36 = arith.constant 0 : index
    %c0_37 = arith.constant 0 : index
    %97 = vector.load %arg5[%c0_36, %c0_37] : memref<32x32xbf16, #tpu.memory_space<vmem>>, vector<32x32xbf16>
    %cst_38 = arith.constant dense<0.000000e+00> : vector<8x32xf32>
    %98 = tpu.matmul %96, %97, %cst_38 {dimension_numbers = #tpu.dot_dimension_numbers<[1], [0], [0], [1], [0, 0, 1, 1], [], []>} : vector<8x32xbf16>, vector<32x32xbf16>, vector<8x32xf32> -> vector<8x32xf32>
    %c0_39 = arith.constant 0 : index
    %c0_40 = arith.constant 0 : index
    %c0_41 = arith.constant 0 : index
    %99 = vector.load %arg4[%c0_39, %c0_40, %c0_41] : memref<1x8x32xbf16, #tpu.memory_space<vmem>>, vector<1x8x32xbf16>
    %100 = vector.shape_cast %99 : vector<1x8x32xbf16> to vector<8x32xbf16>
    %101 = arith.extf %100 : vector<8x32xbf16> to vector<8x32xf32>
    %102 = arith.addf %101, %98 : vector<8x32xf32>
    %103 = arith.truncf %102 : vector<8x32xf32> to vector<8x32xbf16>
    %c0_42 = arith.constant 0 : index
    %c0_43 = arith.constant 0 : index
    %c0_44 = arith.constant 0 : index
    %104 = vector.load %arg6[%c0_42, %c0_43, %c0_44] : memref<1x8x32xbf16, #tpu.memory_space<vmem>>, vector<1x8x32xbf16>
    %105 = vector.shape_cast %104 : vector<1x8x32xbf16> to vector<8x32xbf16>
    %106 = vector.shape_cast %103 : vector<8x32xbf16> to vector<1x8x32xbf16>
    tpu.vector_store %arg6[%c0_42, %c0_43, %c0_44], %106 {strides = array<i32>} : memref<1x8x32xbf16, #tpu.memory_space<vmem>>, vector<1x8x32xbf16>,
    return
  }
  func.func @transform_0(%arg0: i32) -> (i32, i32, i32) {
    %c0_i32 = arith.constant 0 : i32
    %c0_i32_0 = arith.constant 0 : i32
    %c0_i32_1 = arith.constant 0 : i32
    return %arg0, %c0_i32, %c0_i32_0 : i32, i32, i32
  }
  func.func @transform_1(%arg0: i32) -> (i32, i32, i32) {
    %c0_i32 = arith.constant 0 : i32
    %c0_i32_0 = arith.constant 0 : i32
    %c0_i32_1 = arith.constant 0 : i32
    %c0_i32_2 = arith.constant 0 : i32
    return %c0_i32, %c0_i32_0, %c0_i32_1 : i32, i32, i32
  }
  func.func @transform_2(%arg0: i32) -> (i32, i32, i32) {
    %c0_i32 = arith.constant 0 : i32
    %c0_i32_0 = arith.constant 0 : i32
    %c0_i32_1 = arith.constant 0 : i32
    return %arg0, %c0_i32, %c0_i32_0 : i32, i32, i32
  }
  func.func @transform_3(%arg0: i32) -> (i32, i32, i32) {
    %c0_i32 = arith.constant 0 : i32
    %c0_i32_0 = arith.constant 0 : i32
    %c0_i32_1 = arith.constant 0 : i32
    return %arg0, %c0_i32, %c0_i32_0 : i32, i32, i32
  }
  func.func @transform_4(%arg0: i32) -> (i32, i32) {
    %c0_i32 = arith.constant 0 : i32
    %c0_i32_0 = arith.constant 0 : i32
    %c0_i32_1 = arith.constant 0 : i32
    return %c0_i32, %c0_i32_0 : i32, i32
  }
  func.func @transform_5(%arg0: i32) -> (i32, i32, i32) {
    %c0_i32 = arith.constant 0 : i32
    %c0_i32_0 = arith.constant 0 : i32
    %c0_i32_1 = arith.constant 0 : i32
    return %arg0, %c0_i32, %c0_i32_0 : i32, i32, i32
  }
}

module attributes {stable_mosaic.version = 11 : i64} {
  func.func @_rmsnorm_kernel(%arg0: i32, %arg1: memref<16x32xbf16, #tpu.memory_space<vmem>>, %arg2: memref<1x32xf32, #tpu.memory_space<vmem>>, %arg3: memref<16x32xf32, #tpu.memory_space<vmem>>) attributes {dimension_semantics = [#tpu.dimension_semantics<parallel>], iteration_bounds = array<i64: 1>, scalar_prefetch = 0 : i64, scratch_operands = 0 : i64, tpu.core_type = #tpu.core_type<tc>, window_params = [{transform_indices = @transform_0, window_bounds = array<i64: 16, 32>}, {pipeline_mode = #tpu.pipeline_mode<synchronous>, transform_indices = @transform_1, window_bounds = array<i64: 1, 32>}, {transform_indices = @transform_2, window_bounds = array<i64: 16, 32>}]} {
    %c0 = arith.constant 0 : index
    %c0_0 = arith.constant 0 : index
    %0 = vector.load %arg1[%c0, %c0_0] : memref<16x32xbf16, #tpu.memory_space<vmem>>, vector<16x32xbf16>
    %1 = arith.extf %0 : vector<16x32xbf16> to vector<16x32xf32>
    %2 = arith.mulf %1, %1 : vector<16x32xf32>
    %cst = arith.constant dense<0.000000e+00> : vector<16xf32>
    %3 = vector.multi_reduction <add>, %2, %cst [1] : vector<16x32xf32> to vector<16xf32>
    %4 = vector.shape_cast %3 : vector<16xf32> to vector<16x1xf32>
    %cst_1 = arith.constant 3.200000e+01 : f32
    %5 = vector.broadcast %cst_1 : f32 to vector<16x1xf32>
    %6 = arith.divf %4, %5 : vector<16x1xf32>
    %cst_2 = arith.constant 9.99999997E-7 : f32
    %7 = vector.broadcast %cst_2 : f32 to vector<16x1xf32>
    %8 = arith.addf %6, %7 : vector<16x1xf32>
    %9 = math.rsqrt %8 : vector<16x1xf32>
    %10 = vector.broadcast %9 : vector<16x1xf32> to vector<16x32xf32>
    %11 = arith.mulf %1, %10 : vector<16x32xf32>
    %c0_3 = arith.constant 0 : index
    %c0_4 = arith.constant 0 : index
    %12 = vector.load %arg2[%c0_3, %c0_4] : memref<1x32xf32, #tpu.memory_space<vmem>>, vector<1x32xf32>
    %13 = vector.broadcast %12 : vector<1x32xf32> to vector<16x32xf32>
    %14 = arith.mulf %11, %13 : vector<16x32xf32>
    %c0_5 = arith.constant 0 : index
    %c0_6 = arith.constant 0 : index
    %15 = vector.load %arg3[%c0_5, %c0_6] : memref<16x32xf32, #tpu.memory_space<vmem>>, vector<16x32xf32>
    tpu.vector_store %arg3[%c0_5, %c0_6], %14 {strides = array<i32>} : memref<16x32xf32, #tpu.memory_space<vmem>>, vector<16x32xf32>,
    return
  }
  func.func @transform_0(%arg0: i32) -> (i32, i32) {
    %c0_i32 = arith.constant 0 : i32
    %c0_i32_0 = arith.constant 0 : i32
    return %arg0, %c0_i32 : i32, i32
  }
  func.func @transform_1(%arg0: i32) -> (i32, i32) {
    %c0_i32 = arith.constant 0 : i32
    %c0_i32_0 = arith.constant 0 : i32
    %c0_i32_1 = arith.constant 0 : i32
    return %c0_i32, %c0_i32_0 : i32, i32
  }
  func.func @transform_2(%arg0: i32) -> (i32, i32) {
    %c0_i32 = arith.constant 0 : i32
    %c0_i32_0 = arith.constant 0 : i32
    return %arg0, %c0_i32 : i32, i32
  }
}

module attributes {stable_mosaic.version = 11 : i64} {
  func.func @_ln_ff_kernel(%arg0: i32, %arg1: memref<16x32xbf16, #tpu.memory_space<vmem>>, %arg2: memref<1x32xf32, #tpu.memory_space<vmem>>, %arg3: memref<32x64xbf16, #tpu.memory_space<vmem>>, %arg4: memref<32x64xbf16, #tpu.memory_space<vmem>>, %arg5: memref<64x32xbf16, #tpu.memory_space<vmem>>, %arg6: memref<16x32xbf16, #tpu.memory_space<vmem>>) attributes {dimension_semantics = [#tpu.dimension_semantics<parallel>], iteration_bounds = array<i64: 1>, scalar_prefetch = 0 : i64, scratch_operands = 0 : i64, tpu.core_type = #tpu.core_type<tc>, window_params = [{transform_indices = @transform_0, window_bounds = array<i64: 16, 32>}, {pipeline_mode = #tpu.pipeline_mode<synchronous>, transform_indices = @transform_1, window_bounds = array<i64: 1, 32>}, {pipeline_mode = #tpu.pipeline_mode<synchronous>, transform_indices = @transform_2, window_bounds = array<i64: 32, 64>}, {pipeline_mode = #tpu.pipeline_mode<synchronous>, transform_indices = @transform_3, window_bounds = array<i64: 32, 64>}, {pipeline_mode = #tpu.pipeline_mode<synchronous>, transform_indices = @transform_4, window_bounds = array<i64: 64, 32>}, {transform_indices = @transform_5, window_bounds = array<i64: 16, 32>}]} {
    %c0 = arith.constant 0 : index
    %c0_0 = arith.constant 0 : index
    %0 = vector.load %arg1[%c0, %c0_0] : memref<16x32xbf16, #tpu.memory_space<vmem>>, vector<16x32xbf16>
    %1 = arith.extf %0 : vector<16x32xbf16> to vector<16x32xf32>
    %2 = arith.mulf %1, %1 : vector<16x32xf32>
    %cst = arith.constant dense<0.000000e+00> : vector<16xf32>
    %3 = vector.multi_reduction <add>, %2, %cst [1] : vector<16x32xf32> to vector<16xf32>
    %4 = vector.shape_cast %3 : vector<16xf32> to vector<16x1xf32>
    %cst_1 = arith.constant 3.200000e+01 : f32
    %5 = vector.broadcast %cst_1 : f32 to vector<16x1xf32>
    %6 = arith.divf %4, %5 : vector<16x1xf32>
    %cst_2 = arith.constant 9.99999997E-7 : f32
    %7 = vector.broadcast %cst_2 : f32 to vector<16x1xf32>
    %8 = arith.addf %6, %7 : vector<16x1xf32>
    %9 = math.rsqrt %8 : vector<16x1xf32>
    %10 = vector.broadcast %9 : vector<16x1xf32> to vector<16x32xf32>
    %11 = arith.mulf %1, %10 : vector<16x32xf32>
    %c0_3 = arith.constant 0 : index
    %c0_4 = arith.constant 0 : index
    %12 = vector.load %arg2[%c0_3, %c0_4] : memref<1x32xf32, #tpu.memory_space<vmem>>, vector<1x32xf32>
    %13 = vector.broadcast %12 : vector<1x32xf32> to vector<16x32xf32>
    %14 = arith.mulf %11, %13 : vector<16x32xf32>
    %15 = arith.truncf %14 : vector<16x32xf32> to vector<16x32xbf16>
    %c0_5 = arith.constant 0 : index
    %c0_6 = arith.constant 0 : index
    %16 = vector.load %arg3[%c0_5, %c0_6] : memref<32x64xbf16, #tpu.memory_space<vmem>>, vector<32x64xbf16>
    %cst_7 = arith.constant dense<0.000000e+00> : vector<16x64xf32>
    %17 = tpu.matmul %15, %16, %cst_7 {dimension_numbers = #tpu.dot_dimension_numbers<[1], [0], [0], [1], [0, 0, 1, 1], [], []>} : vector<16x32xbf16>, vector<32x64xbf16>, vector<16x64xf32> -> vector<16x64xf32>
    %c0_8 = arith.constant 0 : index
    %c0_9 = arith.constant 0 : index
    %18 = vector.load %arg4[%c0_8, %c0_9] : memref<32x64xbf16, #tpu.memory_space<vmem>>, vector<32x64xbf16>
    %cst_10 = arith.constant dense<0.000000e+00> : vector<16x64xf32>
    %19 = tpu.matmul %15, %18, %cst_10 {dimension_numbers = #tpu.dot_dimension_numbers<[1], [0], [0], [1], [0, 0, 1, 1], [], []>} : vector<16x32xbf16>, vector<32x64xbf16>, vector<16x64xf32> -> vector<16x64xf32>
    %cst_11 = arith.constant 5.000000e-01 : f32
    %20 = vector.broadcast %cst_11 : f32 to vector<16x64xf32>
    %21 = arith.mulf %20, %17 : vector<16x64xf32>
    %cst_12 = arith.constant 4.471500e-02 : f32
    %22 = vector.broadcast %cst_12 : f32 to vector<16x64xf32>
    %23 = arith.mulf %22, %17 : vector<16x64xf32>
    %24 = arith.mulf %23, %17 : vector<16x64xf32>
    %25 = arith.mulf %24, %17 : vector<16x64xf32>
    %26 = arith.addf %17, %25 : vector<16x64xf32>
    %cst_13 = arith.constant 0.797884583 : f32
    %27 = vector.broadcast %cst_13 : f32 to vector<16x64xf32>
    %28 = arith.mulf %27, %26 : vector<16x64xf32>
    %29 = math.tanh %28 : vector<16x64xf32>
    %cst_14 = arith.constant 1.000000e+00 : f32
    %30 = vector.broadcast %cst_14 : f32 to vector<16x64xf32>
    %31 = arith.addf %30, %29 : vector<16x64xf32>
    %32 = arith.mulf %21, %31 : vector<16x64xf32>
    %33 = arith.mulf %32, %19 : vector<16x64xf32>
    %34 = arith.truncf %33 : vector<16x64xf32> to vector<16x64xbf16>
    %c0_15 = arith.constant 0 : index
    %c0_16 = arith.constant 0 : index
    %35 = vector.load %arg5[%c0_15, %c0_16] : memref<64x32xbf16, #tpu.memory_space<vmem>>, vector<64x32xbf16>
    %cst_17 = arith.constant dense<0.000000e+00> : vector<16x32xf32>
    %36 = tpu.matmul %34, %35, %cst_17 {dimension_numbers = #tpu.dot_dimension_numbers<[1], [0], [0], [1], [0, 0, 1, 1], [], []>} : vector<16x64xbf16>, vector<64x32xbf16>, vector<16x32xf32> -> vector<16x32xf32>
    %37 = arith.addf %1, %36 : vector<16x32xf32>
    %38 = arith.truncf %37 : vector<16x32xf32> to vector<16x32xbf16>
    %c0_18 = arith.constant 0 : index
    %c0_19 = arith.constant 0 : index
    %39 = vector.load %arg6[%c0_18, %c0_19] : memref<16x32xbf16, #tpu.memory_space<vmem>>, vector<16x32xbf16>
    tpu.vector_store %arg6[%c0_18, %c0_19], %38 {strides = array<i32>} : memref<16x32xbf16, #tpu.memory_space<vmem>>, vector<16x32xbf16>,
    return
  }
  func.func @transform_0(%arg0: i32) -> (i32, i32) {
    %c0_i32 = arith.constant 0 : i32
    %c0_i32_0 = arith.constant 0 : i32
    return %arg0, %c0_i32 : i32, i32
  }
  func.func @transform_1(%arg0: i32) -> (i32, i32) {
    %c0_i32 = arith.constant 0 : i32
    %c0_i32_0 = arith.constant 0 : i32
    %c0_i32_1 = arith.constant 0 : i32
    return %c0_i32, %c0_i32_0 : i32, i32
  }
  func.func @transform_2(%arg0: i32) -> (i32, i32) {
    %c0_i32 = arith.constant 0 : i32
    %c0_i32_0 = arith.constant 0 : i32
    %c0_i32_1 = arith.constant 0 : i32
    return %c0_i32, %c0_i32_0 : i32, i32
  }
  func.func @transform_3(%arg0: i32) -> (i32, i32) {
    %c0_i32 = arith.constant 0 : i32
    %c0_i32_0 = arith.constant 0 : i32
    %c0_i32_1 = arith.constant 0 : i32
    return %c0_i32, %c0_i32_0 : i32, i32
  }
  func.func @transform_4(%arg0: i32) -> (i32, i32) {
    %c0_i32 = arith.constant 0 : i32
    %c0_i32_0 = arith.constant 0 : i32
    %c0_i32_1 = arith.constant 0 : i32
    return %c0_i32, %c0_i32_0 : i32, i32
  }
  func.func @transform_5(%arg0: i32) -> (i32, i32) {
    %c0_i32 = arith.constant 0 : i32
    %c0_i32_0 = arith.constant 0 : i32
    return %arg0, %c0_i32 : i32, i32
  }
}

</mosaic_0001>

<bundles_post_ra>
// kernel: _lambda_.7
= control target key start
LH: loop header
LB: loop body
LE: loop exit
PB: predicated region body
PF: predicated region fallthrough
CT: control target
= control target key end

     0   :  { %8 = vsyncpa [#allocation3], 0  ;;  %s402_s0 = inlined_call_operand.hbm [shape: bf16[16,32], index: 0, kind: input, shape index: {}]   ;;  %s403_s1 = inlined_call_operand.hbm [shape: f32[1,32], index: 1, kind: input, shape index: {}]   ;;  %s404_s2 = inlined_call_operand.hbm [shape: bf16[32,96], index: 2, kind: input, shape index: {}]   ;;  %s405_s3 = inlined_call_operand.hbm [shape: bf16[16,96], index: 3, kind: output, shape index: {}]  }
   0x1   :  { %9 = vsyncpa [#allocation6], 0 }
   0x2   :  { %10 = vsyncpa [#allocation4], 0  ;;  %s307_s12 = smov [#allocation5]   ;;  %s308_s14 = smov [#allocation2]  }
   0x3   :  { %s29_s13 = sshll.u32 %s307_s12, 4  ;;  %s16_s15 = sshll.u32 %s308_s14, 4  ;;  %s30_s13 = int_to_ptr.vmem [resolvable:$true] %s29_s13  ;;  %s335_s15 = int_to_ptr.vmem [resolvable:$true] %s16_s15 }
   0x4   :  { %s213_s18 = scalar_lea.hbm %s403_s1, 16 }
   0x5   :  { %p214_p0 = scmp.ne.s32.totalorder %s403_s1, %s213_s18  ;;  %p217_p1 = scmp.lt.u32.totalorder %s213_s18, %s403_s1 }
   0x7   :  { %p219_p2 = pnand %p217_p1, %p214_p0 }
   0x9   :  { %222 = shalt.err (!%p219_p2)
}
   0xa   :  { %s223_s23 = scalar_lea.vmem %s30_s13, 16  ;;  %s227_s24 = scalar_lea.vmem %s30_s13, 32 }
   0xb   :  { %p224_p3 = scmp.ne.s32.totalorder %s30_s13, %s223_s23  ;;  %p228_p4 = scmp.lt.s32.totalorder %s30_s13, %s30_s13 }
   0xc   :  { %p229_p5 = scmp.lt.s32.totalorder %s227_s24, %s223_s23 }
   0xe   :  { %p230_p6 = por %p229_p5, %p228_p4 }
  0x10   :  { %p231_p7 = pnand %p230_p6, %p224_p3 }
  0x12   :  { %234 = shalt.err (!%p231_p7)
}
  0x13   :  { %32 = dma.hbm_to_vmem [thread:$0]  %s403_s1, 16, %s30_s13, [#allocation6]  }
  0x14   :  { %s235_s29 = scalar_lea.hbm %s402_s0, 128 }
  0x15   :  { %p236_p8 = scmp.ne.s32.totalorder %s402_s0, %s235_s29  ;;  %p239_p9 = scmp.lt.u32.totalorder %s235_s29, %s402_s0 }
  0x17   :  { %p241_p10 = pnand %p239_p9, %p236_p8 }
  0x19   :  { %244 = shalt.err (!%p241_p10)
}
  0x1a   :  { %s245_s7 = scalar_lea.vmem %s335_s15, 128  ;;  %p250_p12 = scmp.lt.s32.totalorder %s335_s15, %s335_s15 }
  0x1b   :  { %p246_p11 = scmp.ne.s32.totalorder %s335_s15, %s245_s7  ;;  %p251_p13 = scmp.lt.s32.totalorder %s245_s7, %s245_s7 }
  0x1d   :  { %p252_p0 = por %p251_p13, %p250_p12 }
  0x1f   :  { %p253_p1 = pnand %p252_p0, %p246_p11 }
  0x21   :  { %256 = shalt.err (!%p253_p1)
}
  0x22   :  { %s309_s1 = smov 64   ;;  %s310_s8 = smov 4  }
  0x23   :  { %22 = dma.hbm_to_vmem [thread:$0]  %s402_s0, 128, %s335_s15, [#allocation3], %s309_s1, %s309_s1, %s310_s8  }
  0x24   :  { %s311_s11 = smov [#allocation7]   ;;  %s257_s16 = scalar_lea.hbm %s404_s2, 256 }
  0x25   :  { %s38_s12 = sshll.u32 %s311_s11, 4  ;;  %p258_p2 = scmp.ne.s32.totalorder %s404_s2, %s257_s16  ;;  %s39_s12 = int_to_ptr.vmem [resolvable:$true] %s38_s12 }
  0x26   :  { %p261_p3 = scmp.lt.u32.totalorder %s257_s16, %s404_s2 }
  0x28   :  { %p263_p4 = pnand %p261_p3, %p258_p2 }
  0x2a   :  { %266 = shalt.err (!%p263_p4)
}
  0x2b   :  { %s267_s21 = scalar_lea.vmem %s39_s12, 256  ;;  %p272_p6 = scmp.lt.s32.totalorder %s39_s12, %s39_s12 }
  0x2c   :  { %p268_p5 = scmp.ne.s32.totalorder %s39_s12, %s267_s21  ;;  %p273_p7 = scmp.lt.s32.totalorder %s267_s21, %s267_s21 }
  0x2e   :  { %p274_p8 = por %p273_p7, %p272_p6 }
  0x30   :  { %p275_p9 = pnand %p274_p8, %p268_p5 }
  0x32   :  { %278 = shalt.err (!%p275_p9)
}
  0x33   :  { %44 = dma.hbm_to_vmem [thread:$0]  %s404_s2, 256, %s39_s12, [#allocation6], %s309_s1, %s309_s1, %s310_s8  }
  0x34   :  { %301 = dma.done.wait [#allocation3], 128  }
  0x35   :  { %302 = vsyncadd [#allocation3], 4294967168 }
  0x36   :  { %303 = dma.done.wait [#allocation6], 272  }
  0x37   :  { %304 = vsyncadd [#allocation6], 4294967024  ;;  %v185_v0 = vld [vmem:[#allocation2] sm:$0xff]   ;;  %vm61_vm0 = vcmask 261120   ;;  %v207_v7 = vld [vmem:[#allocation7] sm:$0xff]   ;;  %v312_v8 = vmov 0.0  }
  0x38   :  { %v186_v1 = vunpack.c.l.bf16 %v185_v0  ;;  %v187_v2 = vunpack.c.h.bf16 %v185_v0  ;;  %191 = vmatprep.subr.bf16.mxu0 %v312_v8  ;;  %vm313_vm1 = vmmov 0   ;;  %v208_v9 = vld [vmem:[#allocation7 + $0x8] sm:$0xff]   ;;  %v176_v19 = vld [vmem:[#allocation5] ss:$0 sm:$0xff]  ;;  %vm155_vm2 = vcmask 781312   ;;  %s314_s2 = smov [#allocation8]  }
  0x39   :  { %195 = vmatprep.mubr.msk.bf16.mxu0 %vm313_vm1, %v312_v8  ;;  %192 = vmatpush3.bf16.msra.mxu0 %v207_v7  ;;  %s163_s22 = sshll.u32 %s314_s2, 4  ;;  %s164_s22 = int_to_ptr.vmem [resolvable:$true] %s163_s22 }
  0x3a   :  { %v59_v3 = vmul.f32 %v186_v1, %v186_v1  ;;  %v60_v4 = vmul.f32 %v187_v2, %v187_v2  ;;  %193 = vmatprep.subr.bf16.mxu0 %v312_v8  ;;  %s279_s23 = scalar_lea.vmem %s164_s22, 128  ;;  %p284_p11 = scmp.lt.s32.totalorder %s164_s22, %s164_s22 }
  0x3b   :  { %p280_p10 = scmp.ne.s32.totalorder %s164_s22, %s279_s23  ;;  %p285_p12 = scmp.lt.s32.totalorder %s279_s23, %s279_s23 }
  0x3c   :  { %v62_v5 = vsel %vm61_vm0, %v59_v3, 0.0  ;;  %v65_v6 = vsel %vm61_vm0, %v60_v4, 0.0 }
  0x3d   :  { %63 = vadd.xlane.f32.xlu0 %v62_v5  ;;  %194 = vmatpush3.bf16.msra.mxu0 %v208_v9  ;;  %p286_p13 = por %p285_p12, %p284_p11 }
  0x3f   :  { %p287_p0 = pnand %p286_p13, %p280_p10 }
  0x41   :  { %66 = vadd.xlane.f32.xlu0 %v65_v6 }
  0xca   :  { %v64_v10 = vpop.xlane.xlu0 %63 }
  0xcb   :  { %v69_v11 = vmul.f32 0.03125, %v64_v10 }
  0xcd   :  { %v71_v12 = vadd.f32 1e-06, %v69_v11 }
  0xce   :  { %v67_v13 = vpop.xlane.xlu0 %66 }
  0xcf   :  { %209 = vrsqrt.f32 %v71_v12  ;;  %v70_v14 = vmul.f32 0.03125, %v67_v13 }
  0xd1   :  { %v72_v15 = vadd.f32 1e-06, %v70_v14 }
  0xd3   :  { %211 = vrsqrt.f32 %v72_v15 }
  0xd9   :  { %v210_v16 = vpop.eup %209 }
  0xda   :  { %v75_v17 = vmul.f32 %v210_v16, %v186_v1 }
  0xdc   :  { %v84_v21 = vmul.f32 %v176_v19, %v75_v17 }
  0xdd   :  { %v212_v18 = vpop.eup %211 }
  0xde   :  { %v76_v20 = vmul.f32 %v212_v18, %v187_v2 }
  0xe0   :  { %v85_v22 = vmul.f32 %v176_v19, %v76_v20 }
  0xe2   :  { %v86_v23 = vpack.c.bf16 %v85_v22, %v84_v21 }
  0xe4   :  { %196 = vmatmul.mubr.msk.bf16.vlgmr.msra.gmra.mrb[0].mxu0 %vm61_vm0, %v86_v23 }
 0x1b7   :  { %v140_v24 = vpop.f32.mrb[0].mxu0 }
 0x1b8   :  { %v182_v25 = vpack.c.bf16 %v140_v24, %v140_v24  ;;  %v197_v26 = vpop.f32.mrb[1].mxu0 }
 0x1b9   :  { %v143_v27 = vpop.f32.mrb[2].mxu0 }
 0x1ba   :  { %v183_v28 = vpack.c.bf16 %v143_v27, %v143_v27  ;;  %v198_v29 = vpop.f32.mrb[3].mxu0  ;;  %156 = vst.msk [vmem:[#allocation8] sm:$0xf] %vm155_vm2, %v182_v25 }
 0x1bc   :  { %157 = vst.msk [vmem:[#allocation8 + $0x4] sm:$0xf] %vm155_vm2, %v183_v28 }
 0x1bd   :  { %290 = shalt.err (!%p287_p0)
}
 0x1be   :  { %s291_s26 = scalar_lea.hbm %s405_s3, 128 }
 0x1bf   :  { %p292_p1 = scmp.ne.s32.totalorder %s405_s3, %s291_s26  ;;  %p295_p2 = scmp.lt.u32.totalorder %s291_s26, %s405_s3 }
 0x1c1   :  { %p297_p3 = pnand %p295_p2, %p292_p1 }
 0x1c3   :  { %300 = shalt.err (!%p297_p3)
}
 0x1c4   :  { %169 = dma.vmem_to_hbm [thread:$0]  %s164_s22, 128, %s405_s3, [#allocation4], %s309_s1, %s309_s1, %s310_s8  }
 0x1c5   :  { %305 = dma.done.wait [#allocation4], 128  }
 0x1c6   :  { %306 = vsyncadd [#allocation4], 4294967168 }
 0x1c7   :  { %173 = vsyncpa [#allocation3], 1 }
 0x1c8   :  { %174 = vsyncpa [#allocation6], 1 }
 0x1c9   :  { %175 = vsyncpa [#allocation4], 1 }

// kernel: _lambda_.13
= control target key start
LH: loop header
LB: loop body
LE: loop exit
PB: predicated region body
PF: predicated region fallthrough
CT: control target
= control target key end

     0   :  { %7 = vsyncpa [#allocation3], 0  ;;  %s239_s0 = inlined_call_operand.hbm [shape: bf16[16,32], index: 0, kind: input, shape index: {}]   ;;  %s240_s1 = inlined_call_operand.hbm [shape: f32[1,32], index: 1, kind: input, shape index: {}]   ;;  %s241_s2 = inlined_call_operand.hbm [shape: f32[16,32], index: 2, kind: output, shape index: {}]  }
   0x1   :  { %8 = vsyncpa [#allocation6], 0 }
   0x2   :  { %9 = vsyncpa [#allocation4], 0  ;;  %s177_s9 = smov [#allocation2]   ;;  %s105_s13 = scalar_lea.hbm %s239_s0, 128 }
   0x3   :  { %s15_s10 = sshll.u32 %s177_s9, 4  ;;  %p106_p0 = scmp.ne.s32.totalorder %s239_s0, %s105_s13  ;;  %s16_s10 = int_to_ptr.vmem [resolvable:$true] %s15_s10 }
   0x4   :  { %p109_p1 = scmp.lt.u32.totalorder %s105_s13, %s239_s0 }
   0x6   :  { %p111_p2 = pnand %p109_p1, %p106_p0 }
   0x8   :  { %114 = shalt.err (!%p111_p2)
}
   0x9   :  { %s115_s18 = scalar_lea.vmem %s16_s10, 128  ;;  %p120_p4 = scmp.lt.s32.totalorder %s16_s10, %s16_s10 }
   0xa   :  { %p116_p3 = scmp.ne.s32.totalorder %s16_s10, %s115_s18  ;;  %p121_p5 = scmp.lt.s32.totalorder %s115_s18, %s115_s18 }
   0xc   :  { %p122_p6 = por %p121_p5, %p120_p4 }
   0xe   :  { %p123_p7 = pnand %p122_p6, %p116_p3 }
  0x10   :  { %126 = shalt.err (!%p123_p7)
}
  0x11   :  { %s178_s19 = smov 64   ;;  %s179_s20 = smov 4  }
  0x12   :  { %21 = dma.hbm_to_vmem [thread:$0]  %s239_s0, 128, %s16_s10, [#allocation3], %s178_s19, %s178_s19, %s179_s20  }
  0x13   :  { %s180_s23 = smov [#allocation5]   ;;  %s127_s27 = scalar_lea.hbm %s240_s1, 16 }
  0x14   :  { %s28_s24 = sshll.u32 %s180_s23, 4  ;;  %p128_p8 = scmp.ne.s32.totalorder %s240_s1, %s127_s27  ;;  %s29_s24 = int_to_ptr.vmem [resolvable:$true] %s28_s24 }
  0x15   :  { %p131_p9 = scmp.lt.u32.totalorder %s127_s27, %s240_s1 }
  0x17   :  { %p133_p10 = pnand %p131_p9, %p128_p8 }
  0x19   :  { %136 = shalt.err (!%p133_p10)
}
  0x1a   :  { %s137_s4 = scalar_lea.vmem %s29_s24, 16  ;;  %s141_s0 = scalar_lea.vmem %s29_s24, 32 }
  0x1b   :  { %p138_p11 = scmp.ne.s32.totalorder %s29_s24, %s137_s4  ;;  %p142_p12 = scmp.lt.s32.totalorder %s29_s24, %s29_s24 }
  0x1c   :  { %p143_p13 = scmp.lt.s32.totalorder %s141_s0, %s137_s4 }
  0x1e   :  { %p144_p0 = por %p143_p13, %p142_p12 }
  0x20   :  { %p145_p1 = pnand %p144_p0, %p138_p11 }
  0x22   :  { %148 = shalt.err (!%p145_p1)
}
  0x23   :  { %31 = dma.hbm_to_vmem [thread:$0]  %s240_s1, 16, %s29_s24, [#allocation6]  }
  0x24   :  { %171 = dma.done.wait [#allocation3], 128  }
  0x25   :  { %172 = vsyncadd [#allocation3], 4294967168 }
  0x26   :  { %173 = dma.done.wait [#allocation6], 16  }
  0x27   :  { %174 = vsyncadd [#allocation6], 4294967280  ;;  %v91_v0 = vld [vmem:[#allocation2] sm:$0xff]   ;;  %vm44_vm0 = vcmask 261120   ;;  %v89_v14 = vld [vmem:[#allocation5] ss:$0 sm:$0xff] }
  0x28   :  { %v92_v1 = vunpack.c.l.bf16 %v91_v0  ;;  %v93_v2 = vunpack.c.h.bf16 %v91_v0  ;;  %s181_s1 = smov [#allocation7]  }
  0x29   :  { %s76_s7 = sshll.u32 %s181_s1, 4  ;;  %s77_s7 = int_to_ptr.vmem [resolvable:$true] %s76_s7 }
  0x2a   :  { %v42_v3 = vmul.f32 %v92_v1, %v92_v1  ;;  %v43_v4 = vmul.f32 %v93_v2, %v93_v2  ;;  %s149_s8 = scalar_lea.vmem %s77_s7, 256  ;;  %p154_p3 = scmp.lt.s32.totalorder %s77_s7, %s77_s7 }
  0x2b   :  { %p150_p2 = scmp.ne.s32.totalorder %s77_s7, %s149_s8  ;;  %p155_p4 = scmp.lt.s32.totalorder %s149_s8, %s149_s8 }
  0x2c   :  { %v45_v5 = vsel %vm44_vm0, %v42_v3, 0.0  ;;  %v48_v6 = vsel %vm44_vm0, %v43_v4, 0.0 }
  0x2d   :  { %46 = vadd.xlane.f32.xlu0 %v45_v5  ;;  %p156_p5 = por %p155_p4, %p154_p3 }
  0x2f   :  { %p157_p6 = pnand %p156_p5, %p150_p2 }
  0x31   :  { %49 = vadd.xlane.f32.xlu0 %v48_v6 }
  0xba   :  { %v47_v7 = vpop.xlane.xlu0 %46 }
  0xbb   :  { %v52_v8 = vmul.f32 0.03125, %v47_v7 }
  0xbd   :  { %v54_v9 = vadd.f32 1e-06, %v52_v8 }
  0xbe   :  { %v50_v10 = vpop.xlane.xlu0 %49 }
  0xbf   :  { %101 = vrsqrt.f32 %v54_v9  ;;  %v53_v11 = vmul.f32 0.03125, %v50_v10 }
  0xc1   :  { %v55_v12 = vadd.f32 1e-06, %v53_v11 }
  0xc3   :  { %103 = vrsqrt.f32 %v55_v12 }
  0xc9   :  { %v102_v13 = vpop.eup %101 }
  0xca   :  { %v58_v15 = vmul.f32 %v102_v13, %v92_v1 }
  0xcc   :  { %v67_v16 = vmul.f32 %v89_v14, %v58_v15 }
  0xcd   :  { %v104_v17 = vpop.eup %103 }
  0xce   :  { %v59_v18 = vmul.f32 %v104_v17, %v93_v2  ;;  %69 = vst.msk [vmem:[#allocation7] sm:$0xff] %vm44_vm0, %v67_v16 }
  0xd0   :  { %v68_v19 = vmul.f32 %v89_v14, %v59_v18 }
  0xd2   :  { %70 = vst.msk [vmem:[#allocation7 + $0x8] sm:$0xff] %vm44_vm0, %v68_v19 }
  0xd3   :  { %160 = shalt.err (!%p157_p6)
}
  0xd4   :  { %s161_s11 = scalar_lea.hbm %s241_s2, 256 }
  0xd5   :  { %p162_p7 = scmp.ne.s32.totalorder %s241_s2, %s161_s11  ;;  %p165_p8 = scmp.lt.u32.totalorder %s161_s11, %s241_s2 }
  0xd7   :  { %p167_p9 = pnand %p165_p8, %p162_p7 }
  0xd9   :  { %170 = shalt.err (!%p167_p9)
}
  0xda   :  { %s182_s16 = smov 128   ;;  %s183_s17 = smov 8  }
  0xdb   :  { %82 = dma.vmem_to_hbm [thread:$0]  %s77_s7, 256, %s241_s2, [#allocation4], %s182_s16, %s182_s16, %s183_s17  }
  0xdc   :  { %175 = dma.done.wait [#allocation4], 256  }
  0xdd   :  { %176 = vsyncadd [#allocation4], 4294967040 }
  0xde   :  { %86 = vsyncpa [#allocation3], 1 }
  0xdf   :  { %87 = vsyncpa [#allocation6], 1 }
  0xe0   :  { %88 = vsyncpa [#allocation4], 1 }

// kernel: _lambda_.9
= control target key start
LH: loop header
LB: loop body
LE: loop exit
PB: predicated region body
PF: predicated region fallthrough
CT: control target
= control target key end

     0   :  { %10 = vsyncpa [#allocation3], 0  ;;  %s738_s0 = inlined_call_operand.hbm [shape: bf16[16,32], index: 0, kind: input, shape index: {}]   ;;  %s739_s1 = inlined_call_operand.hbm [shape: f32[1,32], index: 1, kind: input, shape index: {}]   ;;  %s740_s2 = inlined_call_operand.hbm [shape: bf16[32,64], index: 2, kind: input, shape index: {}]   ;;  %s741_s3 = inlined_call_operand.hbm [shape: bf16[32,64], index: 3, kind: input, shape index: {}]   ;;  %s742_s4 = inlined_call_operand.hbm [shape: bf16[64,32], index: 4, kind: input, shape index: {}]   ;;  %s743_s5 = inlined_call_operand.hbm [shape: bf16[16,32], index: 5, kind: output, shape index: {}]  }
   0x1   :  { %11 = vsyncpa [#allocation6], 0 }
   0x2   :  { %12 = vsyncpa [#allocation9], 0 }
   0x3   :  { %13 = vsyncpa [#allocation4], 0  ;;  %s592_s18 = smov [#allocation5]   ;;  %s452_s22 = scalar_lea.hbm %s739_s1, 16 }
   0x4   :  { %s32_s19 = sshll.u32 %s592_s18, 4  ;;  %p453_p0 = scmp.ne.s32.totalorder %s739_s1, %s452_s22  ;;  %s33_s19 = int_to_ptr.vmem [resolvable:$true] %s32_s19 }
   0x5   :  { %p456_p1 = scmp.lt.u32.totalorder %s452_s22, %s739_s1 }
   0x7   :  { %p458_p2 = pnand %p456_p1, %p453_p0 }
   0x9   :  { %461 = shalt.err (!%p458_p2)
}
   0xa   :  { %s462_s27 = scalar_lea.vmem %s33_s19, 16  ;;  %s466_s28 = scalar_lea.vmem %s33_s19, 32 }
   0xb   :  { %p463_p3 = scmp.ne.s32.totalorder %s33_s19, %s462_s27  ;;  %p467_p4 = scmp.lt.s32.totalorder %s33_s19, %s33_s19 }
   0xc   :  { %p468_p5 = scmp.lt.s32.totalorder %s466_s28, %s462_s27 }
   0xe   :  { %p469_p6 = por %p468_p5, %p467_p4 }
  0x10   :  { %p470_p7 = pnand %p469_p6, %p463_p3 }
  0x12   :  { %473 = shalt.err (!%p470_p7)
}
  0x13   :  { %35 = dma.hbm_to_vmem [thread:$0]  %s739_s1, 16, %s33_s19, [#allocation6]  }
  0x14   :  { %s593_s6 = smov [#allocation8]   ;;  %s594_s8 = smov [#allocation2]  }
  0x15   :  { %s53_s7 = sshll.u32 %s593_s6, 4  ;;  %s19_s9 = sshll.u32 %s594_s8, 4  ;;  %s54_s7 = int_to_ptr.vmem [resolvable:$true] %s53_s7  ;;  %s20_s9 = int_to_ptr.vmem [resolvable:$true] %s19_s9 }
  0x16   :  { %s474_s12 = scalar_lea.hbm %s741_s3, 256 }
  0x17   :  { %p475_p8 = scmp.ne.s32.totalorder %s741_s3, %s474_s12  ;;  %p478_p9 = scmp.lt.u32.totalorder %s474_s12, %s741_s3 }
  0x19   :  { %p480_p10 = pnand %p478_p9, %p475_p8 }
  0x1b   :  { %483 = shalt.err (!%p480_p10)
}
  0x1c   :  { %s484_s1 = scalar_lea.vmem %s54_s7, 256  ;;  %p489_p12 = scmp.lt.s32.totalorder %s54_s7, %s54_s7 }
  0x1d   :  { %p485_p11 = scmp.ne.s32.totalorder %s54_s7, %s484_s1  ;;  %p490_p13 = scmp.lt.s32.totalorder %s484_s1, %s484_s1 }
  0x1f   :  { %p491_p0 = por %p490_p13, %p489_p12 }
  0x21   :  { %p492_p1 = pnand %p491_p0, %p485_p11 }
  0x23   :  { %495 = shalt.err (!%p492_p1)
}
  0x24   :  { %s595_s17 = smov 64   ;;  %s596_s18 = smov 4  }
  0x25   :  { %59 = dma.hbm_to_vmem [thread:$0]  %s741_s3, 256, %s54_s7, [#allocation9], %s595_s17, %s595_s17, %s596_s18  }
  0x26   :  { %s496_s23 = scalar_lea.hbm %s738_s0, 128 }
  0x27   :  { %p497_p2 = scmp.ne.s32.totalorder %s738_s0, %s496_s23  ;;  %p500_p3 = scmp.lt.u32.totalorder %s496_s23, %s738_s0 }
  0x29   :  { %p502_p4 = pnand %p500_p3, %p497_p2 }
  0x2b   :  { %505 = shalt.err (!%p502_p4)
}
  0x2c   :  { %s506_s28 = scalar_lea.vmem %s20_s9, 128  ;;  %p511_p6 = scmp.lt.s32.totalorder %s20_s9, %s20_s9 }
  0x2d   :  { %p507_p5 = scmp.ne.s32.totalorder %s20_s9, %s506_s28  ;;  %p512_p7 = scmp.lt.s32.totalorder %s506_s28, %s506_s28 }
  0x2f   :  { %p513_p8 = por %p512_p7, %p511_p6 }
  0x31   :  { %p514_p9 = pnand %p513_p8, %p507_p5 }
  0x33   :  { %517 = shalt.err (!%p514_p9)
}
  0x34   :  { %25 = dma.hbm_to_vmem [thread:$0]  %s738_s0, 128, %s20_s9, [#allocation3], %s595_s17, %s595_s17, %s596_s18  }
  0x35   :  { %s597_s30 = smov [#allocation7]   ;;  %s598_s7 = smov [#allocation10]  }
  0x36   :  { %s41_s6 = sshll.u32 %s597_s30, 4  ;;  %s65_s8 = sshll.u32 %s598_s7, 4  ;;  %s42_s6 = int_to_ptr.vmem [resolvable:$true] %s41_s6  ;;  %s66_s8 = int_to_ptr.vmem [resolvable:$true] %s65_s8 }
  0x37   :  { %s518_s12 = scalar_lea.hbm %s740_s2, 256 }
  0x38   :  { %p519_p10 = scmp.ne.s32.totalorder %s740_s2, %s518_s12  ;;  %p522_p11 = scmp.lt.u32.totalorder %s518_s12, %s740_s2 }
  0x3a   :  { %p524_p12 = pnand %p522_p11, %p519_p10 }
  0x3c   :  { %527 = shalt.err (!%p524_p12)
}
  0x3d   :  { %s528_s0 = scalar_lea.vmem %s42_s6, 256  ;;  %p533_p0 = scmp.lt.s32.totalorder %s42_s6, %s42_s6 }
  0x3e   :  { %p529_p13 = scmp.ne.s32.totalorder %s42_s6, %s528_s0  ;;  %p534_p1 = scmp.lt.s32.totalorder %s528_s0, %s528_s0 }
  0x40   :  { %p535_p2 = por %p534_p1, %p533_p0 }
  0x42   :  { %p536_p3 = pnand %p535_p2, %p529_p13 }
  0x44   :  { %539 = shalt.err (!%p536_p3)
}
  0x45   :  { %47 = dma.hbm_to_vmem [thread:$0]  %s740_s2, 256, %s42_s6, [#allocation6], %s595_s17, %s595_s17, %s596_s18  }
  0x46   :  { %s540_s21 = scalar_lea.hbm %s742_s4, 512 }
  0x47   :  { %p541_p4 = scmp.ne.s32.totalorder %s742_s4, %s540_s21  ;;  %p544_p5 = scmp.lt.u32.totalorder %s540_s21, %s742_s4 }
  0x49   :  { %p546_p6 = pnand %p544_p5, %p541_p4 }
  0x4b   :  { %549 = shalt.err (!%p546_p6)
}
  0x4c   :  { %s550_s26 = scalar_lea.vmem %s66_s8, 512  ;;  %p555_p8 = scmp.lt.s32.totalorder %s66_s8, %s66_s8 }
  0x4d   :  { %p551_p7 = scmp.ne.s32.totalorder %s66_s8, %s550_s26  ;;  %p556_p9 = scmp.lt.s32.totalorder %s550_s26, %s550_s26 }
  0x4f   :  { %p557_p10 = por %p556_p9, %p555_p8 }
  0x51   :  { %p558_p11 = pnand %p557_p10, %p551_p7 }
  0x53   :  { %561 = shalt.err (!%p558_p11)
}
  0x54   :  { %71 = dma.hbm_to_vmem [thread:$0]  %s742_s4, 512, %s66_s8, [#allocation9], %s595_s17, %s595_s17, %s596_s18  }
  0x55   :  { %584 = dma.done.wait [#allocation3], 128  }
  0x56   :  { %585 = vsyncadd [#allocation3], 4294967168 }
  0x57   :  { %586 = dma.done.wait [#allocation6], 272  }
  0x58   :  { %587 = vsyncadd [#allocation6], 4294967024 }
  0x59   :  { %588 = dma.done.wait [#allocation9], 768  }
  0x5a   :  { %589 = vsyncadd [#allocation9], 4294966528  ;;  %v384_v0 = vld [vmem:[#allocation2] sm:$0xff]   ;;  %vm94_vm0 = vcmask 261120   ;;  %v436_v7 = vld [vmem:[#allocation7] sm:$0xff]   ;;  %v599_v8 = vmov 0.0  }
  0x5b   :  { %v704_v1 = vunpack.c.l.bf16 %v384_v0  ;;  %v706_v2 = vunpack.c.h.bf16 %v384_v0  ;;  %398 = vmatprep.subr.bf16.mxu1 %v599_v8  ;;  %vm600_vm1 = vmmov 0   ;;  %v437_v9 = vld [vmem:[#allocation7 + $0x8] sm:$0xff]   ;;  %414 = vmatprep.subr.bf16.mxu0 %v599_v8  ;;  %v367_v19 = vld [vmem:[#allocation5] ss:$0 sm:$0xff]  ;;  %v438_v23 = vld [vmem:[#allocation8] sm:$0xff]   ;;  %vm290_vm2 = vcmask 523264  }
  0x5c   :  { %402 = vmatprep.mubr.msk.bf16.mxu1 %vm600_vm1, %v599_v8  ;;  %399 = vmatpush3.bf16.msra.mxu1 %v436_v7  ;;  %v439_v25 = vld [vmem:[#allocation8 + $0x8] sm:$0xff]   ;;  %v440_v26 = vld [vmem:[#allocation10] sm:$0xff]   ;;  %v441_v27 = vld [vmem:[#allocation10 + $0x8] sm:$0xff]   ;;  %vm345_vm3 = vcmask 257024   ;;  %s601_s4 = smov [#allocation11]  }
  0x5d   :  { %v92_v3 = vmul.f32 %v704_v1, %v704_v1  ;;  %v93_v4 = vmul.f32 %v706_v2, %v706_v2  ;;  %400 = vmatprep.subr.bf16.mxu1 %v599_v8  ;;  %422 = vmatprep.mubr.msk.bf16.mxu0 %vm600_vm1, %v599_v8  ;;  %v442_v28 = vld [vmem:[#allocation10 + $0x10] sm:$0xff]   ;;  %v443_v29 = vld [vmem:[#allocation10 + $0x18] sm:$0xff]   ;;  %s353_s28 = sshll.u32 %s601_s4, 4  ;;  %s354_s28 = int_to_ptr.vmem [resolvable:$true] %s353_s28 }
  0x5e   :  { %415 = vmatpush3.bf16.msra.mxu0 %v440_v26  ;;  %s562_s3 = scalar_lea.vmem %s354_s28, 128  ;;  %p567_p13 = scmp.lt.s32.totalorder %s354_s28, %s354_s28 }
  0x5f   :  { %v95_v5 = vsel %vm94_vm0, %v92_v3, 0.0  ;;  %v98_v6 = vsel %vm94_vm0, %v93_v4, 0.0  ;;  %416 = vmatprep.subr.bf16.mxu0 %v599_v8  ;;  %p563_p12 = scmp.ne.s32.totalorder %s354_s28, %s562_s3  ;;  %p568_p0 = scmp.lt.s32.totalorder %s562_s3, %s562_s3 }
  0x60   :  { %96 = vadd.xlane.f32.xlu0 %v95_v5  ;;  %401 = vmatpush3.bf16.msra.mxu1 %v437_v9 }
  0x61   :  { %406 = vmatprep.subr.bf16.mxu1 %v599_v8  ;;  %p569_p1 = por %p568_p0, %p567_p13 }
  0x62   :  { %417 = vmatpush3.bf16.msra.mxu0 %v441_v27 }
  0x63   :  { %418 = vmatprep.subr.bf16.mxu0 %v599_v8  ;;  %p570_p2 = pnand %p569_p1, %p563_p12 }
  0x64   :  { %99 = vadd.xlane.f32.xlu0 %v98_v6 }
  0x66   :  { %419 = vmatpush3.bf16.msra.mxu0 %v442_v28 }
  0x67   :  { %420 = vmatprep.subr.bf16.mxu0 %v599_v8 }
  0x6a   :  { %421 = vmatpush3.bf16.msra.mxu0 %v443_v29 }
  0xed   :  { %v97_v10 = vpop.xlane.xlu0 %96 }
  0xee   :  { %v102_v11 = vmul.f32 0.03125, %v97_v10 }
  0xf0   :  { %v104_v12 = vadd.f32 1e-06, %v102_v11 }
  0xf1   :  { %v100_v13 = vpop.xlane.xlu0 %99 }
  0xf2   :  { %444 = vrsqrt.f32 %v104_v12  ;;  %v103_v14 = vmul.f32 0.03125, %v100_v13 }
  0xf4   :  { %v105_v15 = vadd.f32 1e-06, %v103_v14 }
  0xf6   :  { %446 = vrsqrt.f32 %v105_v15 }
  0xfc   :  { %v445_v16 = vpop.eup %444 }
  0xfd   :  { %v108_v17 = vmul.f32 %v445_v16, %v704_v1 }
  0xff   :  { %v117_v21 = vmul.f32 %v367_v19, %v108_v17 }
 0x100   :  { %v447_v18 = vpop.eup %446 }
 0x101   :  { %v109_v20 = vmul.f32 %v447_v18, %v706_v2 }
 0x103   :  { %v118_v22 = vmul.f32 %v367_v19, %v109_v20 }
 0x105   :  { %v119_v24 = vpack.c.bf16 %v118_v22, %v117_v21 }
 0x107   :  { %403 = vmatmul.mubr.msk.bf16.vlgmr.msra.gmra.mrb[0].mxu1 %vm94_vm0, %v119_v24 }
 0x108   :  { %407 = vmatpush3.bf16.msra.mxu1 %v438_v23  ;;  %410 = vmatprep.mubr.msk.bf16.mxu1 %vm600_vm1, %v599_v8 }
 0x109   :  { %408 = vmatprep.subr.bf16.mxu1 %v599_v8 }
 0x10c   :  { %409 = vmatpush3.bf16.msra.mxu1 %v439_v25 }
 0x10f   :  { %411 = vmatmul.mubr.msk.bf16.vlgmr.msra.gmra.mrb[4].mxu1 %vm94_vm0, %v119_v24 }
 0x1da   :  { %v173_v30 = vpop.f32.mrb[0].mxu1 }
 0x1db   :  { %v239_v31 = vmul.f32 0.044715, %v173_v30  ;;  %v404_v32 = vpop.f32.mrb[1].mxu1  ;;  %v237_v49 = vmul.f32 0.5, %v173_v30 }
 0x1dc   :  { %v176_v33 = vpop.f32.mrb[2].mxu1 }
 0x1dd   :  { %v241_v34 = vmul.f32 %v239_v31, %v173_v30  ;;  %v240_v35 = vmul.f32 0.044715, %v176_v33  ;;  %v405_v36 = vpop.f32.mrb[3].mxu1  ;;  %v238_v53 = vmul.f32 0.5, %v176_v33 }
 0x1df   :  { %v243_v37 = vmul.f32 %v241_v34, %v173_v30  ;;  %v242_v38 = vmul.f32 %v240_v35, %v176_v33 }
 0x1e1   :  { %v244_v39 = vmul.f32 %v242_v38, %v176_v33  ;;  %v245_v40 = vadd.f32 %v243_v37, %v173_v30 }
 0x1e2   :  { %v230_v41 = vpop.f32.mrb[4].mxu1 }
 0x1e3   :  { %v247_v42 = vmul.f32 0.7978846, %v245_v40  ;;  %v412_v43 = vpop.f32.mrb[5].mxu1  ;;  %v246_v44 = vadd.f32 %v244_v39, %v176_v33 }
 0x1e4   :  { %v233_v45 = vpop.f32.mrb[6].mxu1 }
 0x1e5   :  { %448 = vtanh.f32 %v247_v42  ;;  %v248_v46 = vmul.f32 0.7978846, %v246_v44  ;;  %v413_v47 = vpop.f32.mrb[7].mxu1 }
 0x1e7   :  { %450 = vtanh.f32 %v248_v46 }
 0x1ef   :  { %v449_v48 = vpop.eup %448 }
 0x1f0   :  { %v251_v50 = vadd.f32 1.0, %v449_v48 }
 0x1f1   :  { %v451_v51 = vpop.eup %450 }
 0x1f2   :  { %v253_v52 = vmul.f32 %v251_v50, %v237_v49  ;;  %v252_v54 = vadd.f32 1.0, %v451_v51 }
 0x1f4   :  { %v255_v55 = vmul.f32 %v253_v52, %v230_v41  ;;  %v254_v56 = vmul.f32 %v252_v54, %v238_v53 }
 0x1f6   :  { %v256_v57 = vmul.f32 %v254_v56, %v233_v45 }
 0x1f8   :  { %v257_v58 = vpack.c.bf16 %v256_v57, %v255_v55 }
 0x1fa   :  { %423 = vmatmul.mubr.msk.bf16.vlgmr.msra.gmra.mrb[0].mxu0 %vm290_vm2, %v257_v58 }
 0x2cd   :  { %v328_v59 = vpop.f32.mrb[0].mxu0 }
 0x2ce   :  { %v335_v60 = vadd.f32 %v704_v1, %v328_v59  ;;  %v424_v61 = vpop.f32.mrb[1].mxu0 }
 0x2cf   :  { %v331_v62 = vpop.f32.mrb[2].mxu0 }
 0x2d0   :  { %v381_v63 = vpack.c.bf16 %v335_v60, %v335_v60  ;;  %v336_v0 = vadd.f32 %v706_v2, %v331_v62  ;;  %v425_v3 = vpop.f32.mrb[3].mxu0 }
 0x2d2   :  { %v382_v4 = vpack.c.bf16 %v336_v0, %v336_v0  ;;  %346 = vst.msk [vmem:[#allocation11] sm:$0xf] %vm345_vm3, %v381_v63 }
 0x2d4   :  { %347 = vst.msk [vmem:[#allocation11 + $0x4] sm:$0xf] %vm345_vm3, %v382_v4 }
 0x2d5   :  { %573 = shalt.err (!%p570_p2)
}
 0x2d6   :  { %s574_s6 = scalar_lea.hbm %s743_s5, 128 }
 0x2d7   :  { %p575_p3 = scmp.ne.s32.totalorder %s743_s5, %s574_s6  ;;  %p578_p4 = scmp.lt.u32.totalorder %s574_s6, %s743_s5 }
 0x2d9   :  { %p580_p5 = pnand %p578_p4, %p575_p3 }
 0x2db   :  { %583 = shalt.err (!%p580_p5)
}
 0x2dc   :  { %359 = dma.vmem_to_hbm [thread:$0]  %s354_s28, 128, %s743_s5, [#allocation4], %s595_s17, %s595_s17, %s596_s18  }
 0x2dd   :  { %590 = dma.done.wait [#allocation4], 128  }
 0x2de   :  { %591 = vsyncadd [#allocation4], 4294967168 }
 0x2df   :  { %363 = vsyncpa [#allocation3], 1 }
 0x2e0   :  { %364 = vsyncpa [#allocation6], 1 }
 0x2e1   :  { %365 = vsyncpa [#allocation9], 1 }
 0x2e2   :  { %366 = vsyncpa [#allocation4], 1 }

// kernel: _lambda_.8
= control target key start
LH: loop header
LB: loop body
LE: loop exit
PB: predicated region body
PF: predicated region fallthrough
CT: control target
= control target key end

     0   :  { %s1929_s0 = inlined_call_operand.hbm [shape: bf16[2,8,96], index: 0, kind: input, shape index: {}]   ;;  %s1930_s1 = inlined_call_operand.hbm [shape: f32[4,8,8], index: 1, kind: input, shape index: {}]   ;;  %s1931_s2 = inlined_call_operand.hbm [shape: f32[2,1,8], index: 2, kind: input, shape index: {}]   ;;  %s1932_s3 = inlined_call_operand.hbm [shape: bf16[2,8,32], index: 3, kind: input, shape index: {}]   ;;  %s1933_s4 = inlined_call_operand.hbm [shape: bf16[32,32], index: 4, kind: input, shape index: {}]   ;;  %s1934_s5 = inlined_call_operand.hbm [shape: bf16[2,8,32], index: 5, kind: output, shape index: {}]  }
   0x1   :  { %1951 = sst [smem:[#allocation22_spill]] %s1929_s0 }
   0x2   :  { %10 = vsyncpa [#allocation4], 0 }
   0x3   :  { %12 = vsyncpa [#allocation4 + $0x1], 0 }
   0x4   :  { %13 = vsyncpa [#allocation7], 0 }
   0x5   :  { %14 = vsyncpa [#allocation5], 0 }
   0x6   :  { %16 = vsyncpa [#allocation5 + $0x1], 0  ;;  %s1546_s18 = smov 0   ;;  %s1548_s19 = smov 0  }
   0x7   :  { %s1550_s20 = smov 0   ;;  %s1552_s21 = smov 0  }
   0x8 LB: > { %1952 = sst [smem:[#allocation17_spill]] %s1484_s20  ;;  %s1567_s22 = sadd.s32 1, %s1488_s21   ;;  %s1488_s21 = sphi %s1552_s21, %s1982_s21   ;;  %s1484_s20 = sphi %s1550_s20, %s1984_s20   ;;  %s1480_s19 = sphi %s1548_s19, %s1986_s19   ;;  %s1476_s18 = sphi %s1546_s18, %s1985_s18  }
   0x9   : > { %1953 = sst [smem:[#allocation18_spill]] %s1488_s21  ;;  %s29_s23 = sadd.s32 1, %s1484_s20 }
   0xa   : > { %1954 = sst [smem:[#allocation19_spill]] %s1567_s22  ;;  %s26_s24 = ssub.s32 %s1488_s21, %s1567_s22 }
   0xb   : > { %p1935_p0 = scmp.ne.s32.totalorder %s1484_s20, %s1480_s19  ;;  %p27_p1 = scmp.eq.s32.totalorder %s26_s24, 0 }
   0xc   : > { %p37_p2 = scmp.eq.s32.totalorder %s1488_s21, 0  ;;  %p1187_p4 = scmp.lt.s32.totalorder %s1488_s21, 2 }
   0xd   : > { %s1578_s25 = scalar_select %p27_p1, %s1484_s20, %s29_s23  }
   0xe   : > { %p38_p5 = por %p37_p2, %p1935_p0  ;;  %s212_s26 = sand.u32 1, %s1488_s21  }
   0xf   : > { %1955 = sst [smem:[#allocation20_spill]] %s1578_s25  ;;  %s214_s27 = sand.u32 1, %s1484_s20  }
  0x10   : > { %s1587_s28 = sshll.u32 %s214_s27, 2  ;;  %s1040_s29 = sshll.u32 %s1488_s21, 6 }
  0x11   : > { %s1956_s0 = sld [smem:[#allocation22_spill]]  ;;  %s216_s8 = scalar_lea.vmem [#allocation3], %s1587_s28 }
  0x12   : > { %s223_s9 = sshll.u32 %s216_s8, 4  ;;  %p1596_p6 = pnand %p1187_p4, %p38_p5  ;;  %s1600_s9 = int_to_ptr.vmem [resolvable:$true] %s223_s9 }
  0x13   : > { %s1605_s13 = scalar_lea.hbm %s1932_s3, %s1040_s29  ;;  %s1607_s14 = scalar_lea.sflag [#allocation4], %s212_s26 }
  0x14   : > { %s1957_s10 = scalar_select %p1596_p6, 1, 0 }
  0x15   : > { %p1613_p8 = pneg %p1596_p6 }
  0x17   : > { %s1593_s7 = scalar_lea.hbm %s1956_s0, %s1040_s29  ;;  %s1269_s24 = scalar_lea.hbm %s1956_s0, 128 }
  0x18   : > { %s1264_s15 = scalar_lea.hbm %s1593_s7, 64  ;;  %p1270_p11 = scmp.lt.u32.totalorder %s1593_s7, %s1956_s0 }
  0x19   : > { %p1265_p7 = scmp.ne.s32.totalorder %s1593_s7, %s1264_s15  ;;  %p1271_p12 = scmp.lt.u32.totalorder %s1269_s24, %s1264_s15 }
  0x1a   : > { %s1958_s16 = scalar_select %p1613_p8, 1, 0 }
  0x1b   : > { %p1267_p9 = pnand %p1613_p8, %p1265_p7  ;;  %p1272_p13 = por %p1271_p12, %p1270_p11 }
  0x1c   : > { %p1273_p1 = scmp.lt.u32.totalorder %s1264_s15, %s1593_s7 }
  0x1d   : > { %p1268_p10 = pneg %p1267_p9 }
  0x1e   : > { %p1274_p2 = por %p1273_p1, %p1272_p13 }
  0x20   : > { %p1275_p4 = pnand %p1274_p2, %p1268_p10 }
  0x22   : > { %1278 = shalt.err (!%p1275_p4)
}
  0x23   : > { %s1279_s26 = scalar_lea.vmem %s1600_s9, 64  ;;  %s1490_s6 = smov [#allocation3]  }
  0x24   : > { %p1280_p5 = scmp.ne.s32.totalorder %s1600_s9, %s1279_s26  ;;  %s1284_s8 = sshll.u32 %s1490_s6, 4  ;;  %s1285_s8 = int_to_ptr.vmem [resolvable:$false] %s1284_s8 }
  0x25   : > { %s1286_s11 = scalar_lea.vmem %s1285_s8, 128  ;;  %p1287_p3 = scmp.lt.s32.totalorder %s1600_s9, %s1285_s8 }
  0x26   : > { %p1282_p7 = pnand %p1280_p5, %p1613_p8  ;;  %p1288_p0 = scmp.lt.s32.totalorder %s1286_s11, %s1279_s26 }
  0x28   : > { %p1283_p9 = pneg %p1282_p7  ;;  %p1289_p11 = por %p1288_p0, %p1287_p3 }
  0x2a   : > { %p1290_p12 = pnand %p1289_p11, %p1283_p9 }
  0x2c   : > { %1293 = shalt.err (!%p1290_p12)
}
  0x2d   : > { %1174 = dma.hbm_to_vmem [thread:$0]  (!%p1596_p6), %s1593_s7, 64, %s1600_s9, %s1607_s14  }
  0x2e   : > { %s1638_s12 = sadd.s32 4294967295, %s1488_s21   ;;  %s1034_s15 = sadd.s32 4294967294, %s1488_s21  }
  0x2f   : > { %p42_p0 = scmp.ne.s32.totalorder %s1480_s19, %s1476_s18  ;;  %p1940_p3 = scmp.eq.s32.totalorder %s1638_s12, 0 }
  0x30   : > { %p160_p10 = scmp.eq.s32.totalorder %s1638_s12, 1  ;;  %p166_p13 = scmp.eq.s32.totalorder %s1034_s15, 1 }
  0x31   : > { %p1647_p1 = por %p1940_p3, %p42_p0  ;;  %p1035_p2 = scmp.ge.s32.totalorder %s1488_s21, 1 }
  0x32   : > { %p1960_p4 = scmp.ne.s32.totalorder %s1484_s20, %s1480_s19  ;;  %p1659_p7 = por %p166_p13, %p42_p0 }
  0x33   : > { %s1959_s17 = scalar_select %p1647_p1, 1, 0 }
  0x34   : > { %p1655_p5 = por %p160_p10, %p1960_p4  ;;  %p173_p9 = scmp.lt.s32.totalorder %s1488_s21, 3 }
  0x35   : > { %s1962_s9 = scalar_select %p1659_p7, 1, 0 }
  0x36   : > { %s1961_s7 = scalar_select %p1655_p5, 1, 0 }
  0x37   : > { %1963 = sst [smem:[#allocation21_spill]] %s1962_s9  ;;  %p1664_p11 = pnand %p1035_p2, %p173_p9 }
  0x38   : > { %s1491_s24 = smov [#allocation6]   ;;  %s1041_s29 = sshll.u32 %s1488_s21, 4 }
  0x39   : > { %s1964_s23 = scalar_select %p1664_p11, 1, 0 }
  0x3a   : > { %s185_s30 = sshll.u32 %s1491_s24, 4  ;;  %p1164_p12 = pneg %p1664_p11  ;;  %s1668_s30 = int_to_ptr.vmem [resolvable:$true] %s185_s30 }
  0x3b   : > { %s233_s26 = scalar_lea.vmem [#allocation8], %s214_s27  ;;  %s1684_s0 = scalar_lea.hbm %s1931_s2, %s1041_s29 }
  0x3c   : > { %s240_s6 = sshll.u32 %s233_s26, 4  ;;  %p1677_p0 = pnand %p1164_p12, %p1940_p3  ;;  %s1686_s6 = int_to_ptr.vmem [resolvable:$true] %s240_s6 }
  0x3d   : > { %s1492_s24 = smov [#allocation10]   ;;  %s1294_s26 = scalar_lea.hbm %s1930_s1, 512 }
  0x3e   : > { %s1965_s8 = scalar_select %p1677_p0, 1, 0 }
  0x3f   : > { %s1688_s25 = sshll.u32 %s1492_s24, 4  ;;  %p1295_p10 = scmp.ne.s32.totalorder %s1930_s1, %s1294_s26  ;;  %s199_s25 = int_to_ptr.vmem [resolvable:$true] %s1688_s25 }
  0x40   : > { %p1945_p13 = pneg %p1677_p0  ;;  %p1301_p9 = scmp.lt.u32.totalorder %s1294_s26, %s1930_s1 }
  0x42   : > { %p1297_p2 = pnand %p1945_p13, %p1295_p10 }
  0x44   : > { %p1298_p4 = pneg %p1297_p2 }
  0x46   : > { %p1303_p12 = pnand %p1301_p9, %p1298_p4 }
  0x48   : > { %1306 = shalt.err (!%p1303_p12)
}
  0x49   : > { %s1307_s20 = scalar_lea.vmem %s1668_s30, 512  ;;  %p1315_p1 = scmp.lt.s32.totalorder %s1668_s30, %s1668_s30 }
  0x4a   : > { %p1308_p3 = scmp.ne.s32.totalorder %s1668_s30, %s1307_s20  ;;  %p1316_p10 = scmp.lt.s32.totalorder %s1307_s20, %s1307_s20 }
  0x4c   : > { %p1310_p7 = pnand %p1308_p3, %p1945_p13  ;;  %p1317_p2 = por %p1316_p10, %p1315_p1 }
  0x4e   : > { %p1311_p5 = pneg %p1310_p7 }
  0x50   : > { %p1318_p11 = pnand %p1317_p2, %p1311_p5 }
  0x52   : > { %1321 = shalt.err (!%p1318_p11)
}
  0x53   : > { %s1493_s21 = smov 128   ;;  %s1494_s22 = smov 8  }
  0x54   : > { %1167 = dma.hbm_to_vmem [thread:$0]  (!%p1677_p0), %s1930_s1, 512, %s1668_s30, [#allocation7], %s1493_s21, %s1493_s21, %s1494_s22  }
  0x55   : > { %s1322_s27 = scalar_lea.hbm %s1684_s0, 16  ;;  %s1327_s11 = scalar_lea.hbm %s1931_s2, 32 }
  0x56   : > { %p1323_p3 = scmp.ne.s32.totalorder %s1684_s0, %s1322_s27  ;;  %p1328_p7 = scmp.lt.u32.totalorder %s1684_s0, %s1931_s2 }
  0x57   : > { %p1329_p11 = scmp.lt.u32.totalorder %s1327_s11, %s1322_s27  ;;  %p1331_p9 = scmp.lt.u32.totalorder %s1322_s27, %s1684_s0 }
  0x58   : > { %p1325_p1 = pnand %p1323_p3, %p1613_p8 }
  0x59   : > { %p1330_p4 = por %p1329_p11, %p1328_p7 }
  0x5a   : > { %p1326_p5 = pneg %p1325_p1 }
  0x5b   : > { %p1332_p12 = por %p1331_p9, %p1330_p4 }
  0x5d   : > { %p1333_p10 = pnand %p1332_p12, %p1326_p5 }
  0x5f   : > { %1336 = shalt.err (!%p1333_p10)
}
  0x60   : > { %s1337_s30 = scalar_lea.vmem %s1686_s6, 16  ;;  %s1495_s21 = smov [#allocation8]  }
  0x61   : > { %p1338_p2 = scmp.ne.s32.totalorder %s1686_s6, %s1337_s30  ;;  %s1342_s22 = sshll.u32 %s1495_s21, 4  ;;  %s1343_s22 = int_to_ptr.vmem [resolvable:$false] %s1342_s22 }
  0x62   : > { %s1344_s9 = scalar_lea.vmem %s1343_s22, 32  ;;  %p1345_p13 = scmp.lt.s32.totalorder %s1686_s6, %s1343_s22 }
  0x63   : > { %p1340_p3 = pnand %p1338_p2, %p1613_p8  ;;  %p1346_p0 = scmp.lt.s32.totalorder %s1344_s9, %s1337_s30 }
  0x65   : > { %p1341_p1 = pneg %p1340_p3  ;;  %p1347_p7 = por %p1346_p0, %p1345_p13 }
  0x67   : > { %p1348_p11 = pnand %p1347_p7, %p1341_p1 }
  0x69   : > { %1351 = shalt.err (!%p1348_p11)
}
  0x6a   : > { %1177 = dma.hbm_to_vmem [thread:$0]  (!%p1596_p6), %s1684_s0, 16, %s1686_s6, %s1607_s14  }
  0x6b   : > { %s251_s15 = scalar_lea.vmem [#allocation9], %s1587_s28  ;;  %s1352_s29 = scalar_lea.hbm %s1933_s4, 256 }
  0x6c   : > { %s258_s24 = sshll.u32 %s251_s15, 4  ;;  %p1353_p0 = scmp.ne.s32.totalorder %s1933_s4, %s1352_s29  ;;  %s259_s24 = int_to_ptr.vmem [resolvable:$true] %s258_s24 }
  0x6d   : > { %p1966_p13 = scmp.ne.s32.totalorder %s1965_s8, 0  ;;  %p1359_p12 = scmp.lt.u32.totalorder %s1352_s29, %s1933_s4 }
  0x6f   : > { %p1967_p5 = pneg %p1966_p13 }
  0x71   : > { %p1355_p4 = pnand %p1353_p0, %p1967_p5 }
  0x73   : > { %p1356_p9 = pneg %p1355_p4 }
  0x75   : > { %p1361_p10 = pnand %p1359_p12, %p1356_p9 }
  0x77   : > { %1364 = shalt.err (!%p1361_p10)
}
  0x78   : > { %s1365_s0 = scalar_lea.vmem %s199_s25, 256  ;;  %p1968_p3 = pmov %p1967_p5 }
  0x79   : > { %p1366_p2 = scmp.ne.s32.totalorder %s199_s25, %s1365_s0  ;;  %p1373_p11 = scmp.lt.s32.totalorder %s199_s25, %s199_s25 }
  0x7a   : > { %p1374_p6 = scmp.lt.s32.totalorder %s1365_s0, %s1365_s0 }
  0x7b   : > { %p1368_p1 = pnand %p1366_p2, %p1968_p3 }
  0x7c   : > { %p1375_p8 = por %p1374_p6, %p1373_p11 }
  0x7d   : > { %p1369_p7 = pneg %p1368_p1 }
  0x7f   : > { %p1376_p0 = pnand %p1375_p8, %p1369_p7 }
  0x81   : > { %1379 = shalt.err (!%p1376_p0)
}
  0x82   : > { %s1496_s28 = smov 64   ;;  %s1497_s6 = smov 4  }
  0x83   : > { %1170 = dma.hbm_to_vmem [thread:$0]  (!%p1966_p13), %s1933_s4, 256, %s199_s25, [#allocation7], %s1496_s28, %s1496_s28, %s1497_s6  }
  0x84   : > { %s1380_s15 = scalar_lea.hbm %s1605_s13, 64  ;;  %p1969_p4 = scmp.ne.s32.totalorder %s1958_s16, 0 }
  0x85   : > { %p1381_p5 = scmp.ne.s32.totalorder %s1605_s13, %s1380_s15  ;;  %s1385_s29 = scalar_lea.hbm %s1932_s3, 128 }
  0x86   : > { %p1386_p9 = scmp.lt.u32.totalorder %s1605_s13, %s1932_s3  ;;  %p1387_p12 = scmp.lt.u32.totalorder %s1385_s29, %s1380_s15 }
  0x87   : > { %p1383_p6 = pnand %p1381_p5, %p1969_p4  ;;  %p1389_p2 = scmp.lt.u32.totalorder %s1380_s15, %s1605_s13 }
  0x88   : > { %p1388_p10 = por %p1387_p12, %p1386_p9 }
  0x89   : > { %p1384_p8 = pneg %p1383_p6 }
  0x8a   : > { %p1390_p3 = por %p1389_p2, %p1388_p10 }
  0x8c   : > { %p1391_p1 = pnand %p1390_p3, %p1384_p8 }
  0x8e   : > { %1394 = shalt.err (!%p1391_p1)
}
  0x8f   : > { %s1395_s25 = scalar_lea.vmem %s259_s24, 64  ;;  %s1498_s8 = smov [#allocation9]  }
  0x90   : > { %p1396_p13 = scmp.ne.s32.totalorder %s259_s24, %s1395_s25  ;;  %s1400_s30 = sshll.u32 %s1498_s8, 4  ;;  %s1401_s30 = int_to_ptr.vmem [resolvable:$false] %s1400_s30 }
  0x91   : > { %s1402_s21 = scalar_lea.vmem %s1401_s30, 128  ;;  %p1403_p0 = scmp.lt.s32.totalorder %s259_s24, %s1401_s30 }
  0x92   : > { %p1398_p7 = pnand %p1396_p13, %p1969_p4  ;;  %p1404_p5 = scmp.lt.s32.totalorder %s1402_s21, %s1395_s25 }
  0x94   : > { %p1399_p11 = pneg %p1398_p7  ;;  %p1405_p6 = por %p1404_p5, %p1403_p0 }
  0x96   : > { %p1406_p9 = pnand %p1405_p6, %p1399_p11 }
  0x98   : > { %1409 = shalt.err (!%p1406_p9)
}
  0x99   : > { %p1970_p12 = scmp.ne.s32.totalorder %s1957_s10, 0  ;;  %p1971_p8 = scmp.ne.s32.totalorder %s1964_s23, 0 }
  0x9a   : > { %s269_s16 = sand.u32 (!%p1971_p8), 1, %s1638_s12   ;;  %s1783_s0 = sand.u32 (!%p1971_p8), 1, %s1480_s19  }
  0x9b   : > { %1180 = dma.hbm_to_vmem [thread:$0]  (!%p1970_p12), %s1605_s13, 64, %s259_s24, %s1607_s14  }
  0x9c   : > { %267 = sbr.rel (%p1971_p8) target bundleno = 1999 (0x7cf), region = 40  ;;  %s1786_s28 = sshll.u32 (!%p1971_p8), %s1783_s0, 2 }
  0x9d   : > { %s270_s6 = scalar_lea.sflag (!%p1971_p8), [#allocation4], %s269_s16  ;;  %s273_s22 = scalar_lea.vmem (!%p1971_p8), [#allocation3], %s1786_s28 }
  0x9e   : > { %p1972_p4 = scmp.ne.s32.totalorder (!%p1971_p8), %s1959_s17, 0 }
  0xa3   : > { %1455 = dma.done.wait (%p1972_p4), %s270_s6, 64  }
  0xa4   : > { %1457 = vsyncadd (%p1972_p4), %s270_s6, 4294967232  ;;  %p1973_p10 = scmp.eq.s32.totalorder %s1638_s12, 0 }
  0xa6   : > { %1459 = dma.done.wait (%p1973_p10), [#allocation7], 512   ;;  %p1974_p2 = pmov %p1973_p10 }
  0xa7   : > { %s285_s10 = scalar_lea.vmem [#allocation8], %s1783_s0 }
  0xa8   : > { %1461 = vsyncadd (%p1974_p2), [#allocation7], 4294966784 }
  0xa9   : > { %1463 = dma.done.wait (%p1972_p4), %s270_s6, 80  }
  0xaa   : > { %1465 = vsyncadd (%p1972_p4), %s270_s6, 4294967216  ;;  %s294_s13 = scalar_lea.vmem [#allocation9], %s1786_s28  ;;  %p1975_p3 = pmov %p1974_p2 }
  0xab   : > { %p1976_p1 = pmov %p1974_p2 }
  0xac   : > { %1467 = dma.done.wait (%p1975_p3), [#allocation7], 256  }
  0xad   : > { %1469 = vsyncadd (%p1976_p1), [#allocation7], 4294967040  ;;  %v1499_v0 = vmov 0.0   ;;  %vm1500_vm0 = vmmov 0   ;;  %v335_v1 = vld [vmem:[%s273_s22] sm:$0xf] }
  0xae   : > { %1092 = vmatprep.subr.bf16.mxu0 %v1499_v0  ;;  %1094 = vmatprep.mubr.msk.bf16.mxu0 %vm1500_vm0, %v1499_v0  ;;  %v1813_v2 = vcombine.low %v335_v1, %v335_v1  ;;  %s1501_s14 = smov 96   ;;  %vm343_vm1 = vcmask 64512   ;;  %s1502_s17 = smov 64   ;;  %v337_v5 = vld [vmem:[#allocation6] sm:$0xff]  ;;  %v1823_v7 = vld [vmem:[%s285_s10] ss:$0 sm:$0xff] }
  0xaf   : > { %1098 = vmatprep.subr.bf16.mxu1 %v1499_v0  ;;  %1100 = vmatprep.mubr.msk.bf16.mxu1 %vm1500_vm0, %v1499_v0  ;;  %s1503_s23 = smov 88   ;;  %s1504_s24 = smov 72   ;;  %vm414_vm2 = vcmask 1043456   ;;  %vm459_vm3 = vcmask 60416   ;;  %v462_v39 = vld [vmem:[#allocation6 + $0x8] sm:$0xff]  ;;  %v584_v47 = vld [vmem:[#allocation6 + $0x10] sm:$0xff] }
  0xb0   : > { %341 = vrot.lane.b32.xlu0 %v1813_v2, %s1501_s14  ;;  %409 = vrot.lane.b32.xlu1 %v1813_v2, %s1502_s17  ;;  %s1505_s9 = smov 120   ;;  %s1506_s15 = smov 80   ;;  %v706_v55 = vld [vmem:[#allocation6 + $0x18] sm:$0xff]  ;;  %vm581_vm4 = vcmask 126016   ;;  %vm703_vm5 = vcmask 191616   ;;  %vm825_vm6 = vcmask 257216  }
  0xb1   : > { %s1507_s27 = smov 112   ;;  %s1508_s26 = smov 104   ;;  %vm844_vm7 = vcmask 261120   ;;  %vm892_vm8 = vcmask 257024  }
  0xb2   : > { %s1509_s29 = smov 56   ;;  %s1510_s11 = smov 48  }
  0xb3   : > { %s1511_s20 = smov 40   ;;  %s1512_s25 = smov 8  }
  0xb4   : > { %465 = vrot.lane.b32.xlu1 %v1813_v2, %s1503_s23  ;;  %s1513_s8 = smov 16   ;;  %s1514_s30 = smov 24  }
  0xb5   : > { %s1067_s21 = sshll.u32 %s1638_s12, 6  ;;  %s333_s16 = scalar_lea.vmem [#allocation11], %s1786_s28 }
  0xb6   : > { %s908_s6 = sshll.u32 %s333_s16, 4  ;;  %s1885_s14 = scalar_lea.hbm %s1934_s5, %s1067_s21  ;;  %s1887_s6 = int_to_ptr.vmem [resolvable:$true] %s908_s6 }
  0xb7   : > { %s895_s12 = scalar_lea.sflag [#allocation5], %s1783_s0  ;;  %s1410_s28 = scalar_lea.vmem %s1887_s6, 64 }
  0xb8   : > { %p1411_p13 = scmp.ne.s32.totalorder %s1887_s6, %s1410_s28  ;;  %p1977_p7 = scmp.ne.s32.totalorder %s1961_s7, 0 }
  0xba   : > { %p1412_p11 = pnand %p1411_p13, %p1977_p7 }
  0xbc   : > { %p1413_p0 = pneg %p1412_p11 }
 0x122   : > { %v342_v3 = vpop.permute.xlu0 %341  ;;  %v410_v14 = vpop.permute.xlu1 %409 }
 0x123   : > { %v348_v4 = vsel %vm343_vm1, %v342_v3, 0  ;;  %v416_v15 = vsel %vm414_vm2, %v410_v14, 0 }
 0x124   : > { %1093 = vmatpush3.bf16.xpose.msra.mxu0 %v348_v4  ;;  %1099 = vmatpush3.bf16.msra.mxu1 %v416_v15 }
 0x125   : > { %1110 = vmatprep.subr.bf16.mxu0 %v1499_v0  ;;  %1104 = vmatprep.subr.bf16.mxu1 %v1499_v0 }
 0x126   : > { %v466_v21 = vpop.permute.xlu1 %465 }
 0x127   : > { %v471_v27 = vsel %vm343_vm1, %v466_v21, 0 }
 0x12b   : > { %1095 = vmatmul.mubr.msk.bf16.vlgmr.msra.gmra.mrb[0].mxu0 %vm343_vm1, %v335_v1 }
 0x12c   : > { %1112 = vmatprep.mubr.msk.bf16.mxu0 %vm1500_vm0, %v1499_v0 }
 0x1fe   : > { %v384_v6 = vpop.f32.mrb[0].mxu0 }
 0x1ff   : > { %v385_v8 = vadd.f32 %v384_v6, %v337_v5  ;;  %v1096_v9 = vpop.f32.mrb[1].mxu0 }
 0x200   : > { %v387_v10 = vpop.f32.mrb[2].mxu0 }
 0x201   : > { %v1097_v11 = vpop.f32.mrb[3].mxu0  ;;  %v396_v12 = vadd.f32 %v1823_v7, %v385_v8 }
 0x203   : > { %v397_v13 = vsel %vm343_vm1, %v396_v12, -inf }
 0x204   : > { %398 = vmax.xlane.f32.xlu0 %v397_v13 }
 0x21a   : > { %709 = vrot.lane.b32.xlu0 %v1813_v2, %s1504_s24 }
 0x291   : > { %v399_v16 = vpop.xlane.xlu0 %398 }
 0x292   : > { %v400_v17 = vsub.f32 %v396_v12, %v399_v16 }
 0x294   : > { %v401_v18 = vmul.f32 1.442695, %v400_v17 }
 0x295   : > { %v710_v30 = vpop.permute.xlu0 %709 }
 0x296   : > { %1248 = vpow2.f32 %v401_v18  ;;  %v715_v32 = vsel %vm343_vm1, %v710_v30, 0 }
 0x2a0   : > { %v1249_v19 = vpop.eup %1248 }
 0x2a1   : > { %v403_v20 = vsel %vm343_vm1, %v1249_v19, 0.0 }
 0x2a2   : > { %404 = vadd.xlane.f32.xlu1 %v403_v20 }
 0x2b3   : > { %463 = vrot.lane.b32.xlu1 %v1813_v2, %s1505_s9 }
 0x2b7   : > { %587 = vrot.lane.b32.xlu1 %v1813_v2, %s1506_s15 }
 0x2bb   : > { %585 = vrot.lane.b32.xlu1 %v1813_v2, %s1507_s27 }
 0x2bf   : > { %707 = vrot.lane.b32.xlu1 %v1813_v2, %s1508_s26 }
 0x32f   : > { %v405_v22 = vpop.xlane.xlu1 %404 }
 0x330   : > { %1250 = vrcp.f32 %v405_v22 }
 0x333   : > { %v464_v25 = vpop.permute.xlu1 %463 }
 0x337   : > { %v588_v28 = vpop.permute.xlu1 %587 }
 0x338   : > { %v593_v29 = vsel %vm343_vm1, %v588_v28, 0 }
 0x33a   : > { %v1251_v23 = vpop.eup %1250 }
 0x33b   : > { %v407_v24 = vmul.f32 %v1251_v23, %v1249_v19  ;;  %v586_v31 = vpop.permute.xlu1 %585 }
 0x33d   : > { %v408_v26 = vpack.c.bf16 %v407_v24, %v407_v24 }
 0x33f   : > { %1101 = vmatmul.mubr.msk.bf16.vlgmr.msra.gmra.mrb[0].mxu1 %vm343_vm1, %v408_v26  ;;  %v708_v33 = vpop.permute.xlu1 %707 }
 0x340   : > { %1105 = vmatpush3.bf16.xpose.msra.mxu1 %v471_v27  ;;  %1106 = vmatprep.mubr.msk.bf16.mxu1 %vm1500_vm0, %v1499_v0 }
 0x341   : > { %1116 = vmatprep.subr.bf16.mxu1 %v1499_v0 }
 0x347   : > { %1107 = vmatmul.mubr.msk.bf16.vlgmr.msra.gmra.mrb[4].mxu1 %vm343_vm1, %v464_v25 }
 0x348   : > { %1117 = vmatpush3.bf16.xpose.msra.mxu1 %v593_v29  ;;  %1118 = vmatprep.mubr.msk.bf16.mxu1 %vm1500_vm0, %v1499_v0 }
 0x349   : > { %1128 = vmatprep.subr.bf16.mxu1 %v1499_v0 }
 0x34f   : > { %1119 = vmatmul.mubr.msk.bf16.vlgmr.msra.gmra.mrb[8].mxu1 %vm343_vm1, %v586_v31 }
 0x350   : > { %1129 = vmatpush3.bf16.xpose.msra.mxu1 %v715_v32  ;;  %1130 = vmatprep.mubr.msk.bf16.mxu1 %vm1500_vm0, %v1499_v0 }
 0x351   : > { %1140 = vmatprep.subr.bf16.mxu1 %v1499_v0 }
 0x357   : > { %1131 = vmatmul.mubr.msk.bf16.vlgmr.msra.gmra.mrb[12].mxu1 %vm343_vm1, %v708_v33 }
 0x358   : > { %1144 = vmatprep.mubr.msk.bf16.mxu1 %vm1500_vm0, %v1499_v0 }
 0x412   : > { %v452_v34 = vpop.f32.mrb[0].mxu1 }
 0x413   : > { %v458_v35 = vpack.c.bf16 %v452_v34, %v452_v34  ;;  %v1102_v36 = vpop.f32.mrb[1].mxu1 }
 0x414   : > { %v455_v37 = vpop.f32.mrb[2].mxu1 }
 0x415   : > { %460 = vst.msk [vmem:[#allocation2] sm:$0xf] %vm459_vm3, %v458_v35  ;;  %v1103_v38 = vpop.f32.mrb[3].mxu1 }
 0x416   : > { %v1246_v38 = vld [vmem:[#allocation10] sm:$0xff]  }
 0x417   : > { %1141 = vmatpush3.bf16.msra.mxu1 %v1246_v38 }
 0x418   : > { %1142 = vmatprep.subr.bf16.mxu1 %v1499_v0 }
 0x41a   : > { %v507_v40 = vpop.f32.mrb[4].mxu1 }
 0x41b   : > { %v508_v41 = vadd.f32 %v507_v40, %v462_v39  ;;  %v1108_v42 = vpop.f32.mrb[5].mxu1  ;;  %v1247_v40 = vld [vmem:[#allocation10 + $0x8] sm:$0xff]  }
 0x41c   : > { %v510_v43 = vpop.f32.mrb[6].mxu1  ;;  %1143 = vmatpush3.bf16.msra.mxu1 %v1247_v40 }
 0x41d   : > { %v1109_v44 = vpop.f32.mrb[7].mxu1  ;;  %v513_v45 = vadd.f32 %v1823_v7, %v508_v41 }
 0x41f   : > { %v514_v46 = vsel %vm343_vm1, %v513_v45, -inf }
 0x420   : > { %515 = vmax.xlane.f32.xlu1 %v514_v46 }
 0x422   : > { %v629_v48 = vpop.f32.mrb[8].mxu1 }
 0x423   : > { %v630_v49 = vadd.f32 %v629_v48, %v584_v47  ;;  %v1120_v50 = vpop.f32.mrb[9].mxu1 }
 0x424   : > { %v632_v51 = vpop.f32.mrb[10].mxu1 }
 0x425   : > { %v635_v52 = vadd.f32 %v1823_v7, %v630_v49  ;;  %v1121_v53 = vpop.f32.mrb[11].mxu1 }
 0x426   : > { %v888_v53 = vld [vmem:[%s294_s13] sm:$0xf]  ;;  %s1515_s13 = smov [#allocation11]  }
 0x427   : > { %v636_v54 = vsel %vm343_vm1, %v635_v52, -inf  ;;  %s1414_s17 = sshll.u32 %s1515_s13, 4  ;;  %s1415_s17 = int_to_ptr.vmem [resolvable:$false] %s1414_s17 }
 0x428   : > { %637 = vmax.xlane.f32.xlu0 %v636_v54  ;;  %v889_v54 = vunpack.c.l.bf16 %v888_v53  ;;  %s1416_s23 = scalar_lea.vmem %s1415_s17, 128  ;;  %p1417_p5 = scmp.lt.s32.totalorder %s1887_s6, %s1415_s17 }
 0x429   : > { %p1418_p6 = scmp.lt.s32.totalorder %s1416_s23, %s1410_s28 }
 0x42a   : > { %v751_v56 = vpop.f32.mrb[12].mxu1 }
 0x42b   : > { %v752_v57 = vadd.f32 %v751_v56, %v706_v55  ;;  %v1132_v58 = vpop.f32.mrb[13].mxu1  ;;  %p1419_p9 = por %p1418_p6, %p1417_p5 }
 0x42c   : > { %v754_v59 = vpop.f32.mrb[14].mxu1 }
 0x42d   : > { %v757_v60 = vadd.f32 %v1823_v7, %v752_v57  ;;  %v1133_v61 = vpop.f32.mrb[15].mxu1  ;;  %p1420_p12 = pnand %p1419_p9, %p1413_p0 }
 0x42f   : > { %v758_v62 = vsel %vm343_vm1, %v757_v60, -inf }
 0x430   : > { %759 = vmax.xlane.f32.xlu1 %v758_v62 }
 0x4ad   : > { %v516_v63 = vpop.xlane.xlu1 %515 }
 0x4ae   : > { %v517_v1 = vsub.f32 %v513_v45, %v516_v63 }
 0x4b0   : > { %v518_v3 = vmul.f32 1.442695, %v517_v1 }
 0x4b2   : > { %1252 = vpow2.f32 %v518_v3 }
 0x4b5   : > { %v638_v7 = vpop.xlane.xlu0 %637 }
 0x4b6   : > { %v639_v12 = vsub.f32 %v635_v52, %v638_v7 }
 0x4b8   : > { %v640_v13 = vmul.f32 1.442695, %v639_v12 }
 0x4bc   : > { %v1253_v4 = vpop.eup %1252 }
 0x4bd   : > { %v760_v5 = vpop.xlane.xlu1 %759  ;;  %v520_v6 = vsel %vm343_vm1, %v1253_v4, 0.0 }
 0x4be   : > { %v761_v8 = vsub.f32 %v757_v60, %v760_v5  ;;  %521 = vadd.xlane.f32.xlu1 %v520_v6 }
 0x4c0   : > { %v762_v9 = vmul.f32 1.442695, %v761_v8 }
 0x4c2   : > { %1254 = vpow2.f32 %v762_v9 }
 0x4c3   : > { %1256 = vpow2.f32 %v640_v13 }
 0x4cc   : > { %v1255_v10 = vpop.eup %1254 }
 0x4cd   : > { %v764_v11 = vsel %vm343_vm1, %v1255_v10, 0.0  ;;  %v1257_v14 = vpop.eup %1256 }
 0x4ce   : > { %765 = vadd.xlane.f32.xlu0 %v764_v11  ;;  %v642_v15 = vsel %vm343_vm1, %v1257_v14, 0.0 }
 0x4cf   : > { %526 = vrot.lane.b32.xlu1 %v1813_v2, %s1509_s29 }
 0x4e4   : > { %648 = vrot.lane.b32.xlu0 %v1813_v2, %s1510_s11 }
 0x4f3   : > { %643 = vadd.xlane.f32.xlu1 %v642_v15 }
 0x504   : > { %770 = vrot.lane.b32.xlu1 %v1813_v2, %s1511_s20 }
 0x54b   : > { %v522_v16 = vpop.xlane.xlu1 %521 }
 0x54c   : > { %1258 = vrcp.f32 %v522_v16 }
 0x54f   : > { %v527_v17 = vpop.permute.xlu1 %526 }
 0x550   : > { %v532_v18 = vsel %vm414_vm2, %v527_v17, 0 }
 0x551   : > { %1111 = vmatpush3.bf16.msra.mxu0 %v532_v18 }
 0x552   : > { %1122 = vmatprep.subr.bf16.mxu0 %v1499_v0 }
 0x556   : > { %v1259_v19 = vpop.eup %1258 }
 0x557   : > { %v524_v20 = vmul.f32 %v1259_v19, %v1253_v4 }
 0x559   : > { %v525_v21 = vpack.c.bf16 %v524_v20, %v524_v20 }
 0x55b   : > { %1113 = vmatmul.mubr.msk.bf16.vlgmr.msra.gmra.mrb[4].mxu0 %vm343_vm1, %v525_v21  ;;  %v766_v22 = vpop.xlane.xlu0 %765 }
 0x55c   : > { %1124 = vmatprep.mubr.msk.bf16.mxu0 %vm1500_vm0, %v1499_v0 }
 0x55f   : > { %v649_v23 = vpop.permute.xlu0 %648 }
 0x560   : > { %v654_v2 = vsel %vm414_vm2, %v649_v23, 0 }
 0x561   : > { %1123 = vmatpush3.bf16.msra.mxu0 %v654_v2 }
 0x562   : > { %1134 = vmatprep.subr.bf16.mxu0 %v1499_v0 }
 0x580   : > { %v644_v24 = vpop.xlane.xlu1 %643 }
 0x581   : > { %1260 = vrcp.f32 %v644_v24 }
 0x582   : > { %1262 = vrcp.f32 %v766_v22 }
 0x584   : > { %v771_v26 = vpop.permute.xlu1 %770 }
 0x585   : > { %v776_v28 = vsel %vm414_vm2, %v771_v26, 0 }
 0x58b   : > { %v1261_v25 = vpop.eup %1260 }
 0x58c   : > { %v646_v27 = vmul.f32 %v1261_v25, %v1257_v14  ;;  %v1263_v30 = vpop.eup %1262 }
 0x58d   : > { %v768_v31 = vmul.f32 %v1263_v30, %v1255_v10 }
 0x58e   : > { %v647_v29 = vpack.c.bf16 %v646_v27, %v646_v27 }
 0x58f   : > { %v769_v32 = vpack.c.bf16 %v768_v31, %v768_v31 }
 0x590   : > { %1125 = vmatmul.mubr.msk.bf16.vlgmr.msra.gmra.mrb[8].mxu0 %vm343_vm1, %v647_v29 }
 0x591   : > { %1135 = vmatpush3.bf16.msra.mxu0 %v776_v28  ;;  %1136 = vmatprep.mubr.msk.bf16.mxu0 %vm1500_vm0, %v1499_v0 }
 0x598   : > { %1137 = vmatmul.mubr.msk.bf16.vlgmr.msra.gmra.mrb[12].mxu0 %vm343_vm1, %v769_v32 }
 0x62e   : > { %v568_v33 = vpop.f32.mrb[4].mxu0 }
 0x62f   : > { %v1070_v34 = vpack.c.bf16 %v568_v33, %v568_v33  ;;  %v1114_v35 = vpop.f32.mrb[5].mxu0 }
 0x630   : > { %v571_v36 = vpop.f32.mrb[6].mxu0 }
 0x631   : > { %578 = vrot.lane.b32.xlu1 %v1070_v34, %s1512_s25  ;;  %v1115_v37 = vpop.f32.mrb[7].mxu0 }
 0x663   : > { %v690_v39 = vpop.f32.mrb[8].mxu0 }
 0x664   : > { %v1071_v41 = vpack.c.bf16 %v690_v39, %v690_v39  ;;  %v1126_v42 = vpop.f32.mrb[9].mxu0 }
 0x665   : > { %v693_v43 = vpop.f32.mrb[10].mxu0 }
 0x666   : > { %700 = vrot.lane.b32.xlu0 %v1071_v41, %s1513_s8  ;;  %v1127_v44 = vpop.f32.mrb[11].mxu0 }
 0x66b   : > { %v812_v45 = vpop.f32.mrb[12].mxu0 }
 0x66c   : > { %v1072_v46 = vpack.c.bf16 %v812_v45, %v812_v45  ;;  %v1138_v47 = vpop.f32.mrb[13].mxu0 }
 0x66d   : > { %v815_v48 = vpop.f32.mrb[14].mxu0 }
 0x66e   : > { %822 = vrot.lane.b32.xlu1 %v1072_v46, %s1514_s30  ;;  %v1139_v49 = vpop.f32.mrb[15].mxu0 }
 0x6a3   : > { %v579_v50 = vpop.permute.xlu1 %578 }
 0x6a4   : > { %582 = vst.msk [vmem:[#allocation2] sm:$0xf] %vm581_vm4, %v579_v50 }
 0x6d8   : > { %v701_v0 = vpop.permute.xlu0 %700 }
 0x6d9   : > { %704 = vst.msk [vmem:[#allocation2] sm:$0xf] %vm703_vm5, %v701_v0 }
 0x6e0   : > { %v823_v51 = vpop.permute.xlu1 %822 }
 0x6e1   : > { %826 = vst.msk [vmem:[#allocation2] sm:$0xf] %vm825_vm6, %v823_v51 }
 0x6e8   : > { %v827_v52 = vld [vmem:[#allocation2] sm:$0xf] }
 0x6e9   : > { %1145 = vmatmul.mubr.msk.bf16.vlgmr.msra.gmra.mrb[16].mxu1 %vm844_vm7, %v827_v52 }
 0x7bc   : > { %v882_v55 = vpop.f32.mrb[16].mxu1 }
 0x7bd   : > { %v890_v56 = vadd.f32 %v889_v54, %v882_v55  ;;  %v1146_v57 = vpop.f32.mrb[17].mxu1 }
 0x7be   : > { %v885_v58 = vpop.f32.mrb[18].mxu1 }
 0x7bf   : > { %v891_v59 = vpack.c.bf16 %v890_v56, %v890_v56  ;;  %v1147_v60 = vpop.f32.mrb[19].mxu1 }
 0x7c1   : > { %893 = vst.msk [vmem:[%s333_s16] sm:$0xf] %vm892_vm8, %v891_v59 }
 0x7c2   : > { %1423 = shalt.err (!%p1420_p12)
}
 0x7c3   : > { %s1424_s0 = scalar_lea.hbm %s1885_s14, 64  ;;  %s1428_s15 = scalar_lea.hbm %s1934_s5, 128 }
 0x7c4   : > { %p1425_p8 = scmp.ne.s32.totalorder %s1885_s14, %s1424_s0  ;;  %p1429_p2 = scmp.lt.u32.totalorder %s1885_s14, %s1934_s5 }
 0x7c5   : > { %p1430_p3 = scmp.lt.u32.totalorder %s1428_s15, %s1424_s0  ;;  %p1432_p13 = scmp.lt.u32.totalorder %s1424_s0, %s1885_s14 }
 0x7c6   : > { %p1426_p4 = pnand %p1425_p8, %p1977_p7 }
 0x7c7   : > { %p1431_p1 = por %p1430_p3, %p1429_p2 }
 0x7c8   : > { %p1427_p10 = pneg %p1426_p4 }
 0x7c9   : > { %p1433_p11 = por %p1432_p13, %p1431_p1 }
 0x7cb   : > { %p1434_p0 = pnand %p1433_p11, %p1427_p10 }
 0x7cd   : > { %1437 = shalt.err (!%p1434_p0)
}
 0x7ce   : > { %1162 = dma.vmem_to_hbm [thread:$0]  (%p1977_p7), %s1887_s6, 64, %s1885_s14, %s895_s12  }
 0x7cf PF: > { %s1978_s29 = sld [smem:[#allocation21_spill]]  ;;  %s1979_s11 = sld [smem:[#allocation18_spill]] }
 0x7d0   : > { %s920_s20 = sand.u32 1, %s1476_s18  }
 0x7d1   : > { %s921_s25 = scalar_lea.sflag [#allocation5], %s920_s20 }
 0x7d5   : > { %p1980_p5 = scmp.ne.s32.totalorder %s1978_s29, 0  ;;  %p1981_p6 = scmp.ge.s32.totalorder %s1979_s11, 2 }
 0x7d7   : > { %p1182_p9 = pnand %p1981_p6, %p1980_p5 }
 0x7d9   : > { %1471 = dma.done.wait (!%p1182_p9), %s921_s25, 64  }
 0x7da   : > { %1473 = vsyncadd (!%p1182_p9), %s921_s25, 4294967232  ;;  %s1982_s21 = sld [smem:[#allocation19_spill]]  ;;  %s1983_s8 = sld [smem:[#allocation17_spill]] }
 0x7db   : > { %s1984_s20 = sld [smem:[#allocation20_spill]]  ;;  %s1985_s18 = smov %s1480_s19 }
 0x7e0   : > { %p19_p12 = scmp.ge.s32.totalorder %s1982_s21, 4   ;;  %s1986_s19 = smov %s1983_s8 }
 0x7e2   :  { %21 = sbr.rel (!%p19_p12) target bundleno = 8 (0x8), region = 118 }
 0x7e9   :  { %926 = vsyncpa [#allocation4], 1 }
 0x7ea   :  { %928 = vsyncpa [#allocation4 + $0x1], 1 }
 0x7eb   :  { %929 = vsyncpa [#allocation7], 1 }
 0x7ec   :  { %930 = vsyncpa [#allocation5], 1 }
 0x7ed   :  { %932 = vsyncpa [#allocation5 + $0x1], 1 }

</bundles_post_ra>
